<compile_context>
chip_gen: v6e
topology: v6e:2x2x1
jax: 0.10.0
libtpu: 0.0.40
codegen_flags: <defaults>
</compile_context>

<pallas_src>
import math
import functools

import jax
import jax.numpy as jnp
from jax.experimental import pallas as pl
from jax.experimental.pallas import tpu as pltpu


_VMEM_LIMIT = 48 * 1024 * 1024        # headroom under v7x's 64 MiB physical


def _choose_chunk(T, target):
    """Largest chunk length <= target that divides T (>= 1)."""
    c = max(1, min(target, T))
    while T % c:
        c -= 1
    return c


# ------------------ fused (input-proj + recurrence) LSTM layer -----------------

def _bilstm_dir_kernel(x_ref, w_ih_ref, b_ref, w_hh_ref, out_ref,
                       gates_buf, h_buf, c_buf, *, C, Bp, H, n_parts, unroll):
    """One (direction, time-chunk) grid step of a bidirectional LSTM layer.

    x_ref:    (n_parts, C*Bp, D)  input features of this time-chunk
    w_ih_ref: (n_parts, D, 4H)    input weights of this direction (gate order ifog)
    b_ref:    (1, 4H)             b_ih + b_hh of this direction
    w_hh_ref: (H, 4H)             recurrent weights of this direction
    out_ref:  (C*Bp, H)           hidden states of this chunk/direction
    gates_buf:(C*Bp, 4H) scratch  x @ W_ih + b for the chunk
    h_buf/c_buf:(Bp, H) scratch   recurrent state carried across chunks
    """
    d = pl.program_id(0)          # 0 = forward-in-time, 1 = backward-in-time
    i = pl.program_id(1)          # chunk counter within this direction

    # Chunk-wide input projection: one lane-dense MXU matmul per input part.
    g = jnp.dot(x_ref[0], w_ih_ref[0], preferred_element_type=jnp.float32)
    for p in range(1, n_parts):
        g = g + jnp.dot(x_ref[p], w_ih_ref[p],
                        preferred_element_type=jnp.float32)
    gates_buf[...] = g + b_ref[...]

    whh = w_hh_ref[...]

    @pl.when(i == 0)
    def _():
        h_buf[...] = jnp.zeros_like(h_buf)
        c_buf[...] = jnp.zeros_like(c_buf)

    def step(s, carry):
        h, c = carry
        # Local time within the chunk: ascending for fwd, descending for bwd.
        t = jnp.where(d == 0, s, C - 1 - s)
        row = pl.multiple_of(t * Bp, Bp)
        gx = gates_buf[pl.ds(row, Bp), :]                      # (Bp, 4H)
        gates = gx + jnp.dot(h, whh, preferred_element_type=jnp.float32)
        # gate order [i, f, o, g]: one sigmoid slab + one tanh slab
        sg = jax.nn.sigmoid(gates[:, :3 * H])
        gg = jnp.tanh(gates[:, 3 * H:])
        c_new = sg[:, H:2 * H] * c + sg[:, :H] * gg
        h_new = sg[:, 2 * H:] * jnp.tanh(c_new)
        out_ref[pl.ds(row, Bp), :] = h_new        # direct store, no hist/concat
        return h_new, c_new

    h, c = jax.lax.fori_loop(0, C, step, (h_buf[...], c_buf[...]),
                             unroll=unroll)
    h_buf[...] = h
    c_buf[...] = c


def bilstm_layer(x_parts, w_ih, b, w_hh, *, T, Bp, H, chunk_target=64):
    """x_parts: (n_parts, T*Bp, D) -> (2, T*Bp, H) per-direction hidden states."""
    n_parts, N, D = x_parts.shape
    assert N == T * Bp
    G = 4 * H
    assert w_ih.shape == (2, n_parts, D, G)
    C = _choose_chunk(T, chunk_target)
    NC = T // C

    def tc(d, i):     # forward walks chunks up, backward walks them down
        return (1 - d) * i + d * (NC - 1 - i)

    flops = (4 * N * n_parts * D * G          # input projection, both dirs
             + 4 * T * Bp * H * G             # recurrent matmuls, both dirs
             + 2 * T * Bp * 12 * H)           # elementwise
    bytes_accessed = 4 * (2 * n_parts * N * D
                          + 2 * (n_parts * D * G + H * G + G)
                          + 2 * N * H)

    kernel = functools.partial(_bilstm_dir_kernel, C=C, Bp=Bp, H=H,
                               n_parts=n_parts, unroll=min(8, C))
    return pl.pallas_call(
        kernel,
        out_shape=jax.ShapeDtypeStruct((2, N, H), jnp.float32),
        grid=(2, NC),
        in_specs=[
            pl.BlockSpec((n_parts, C * Bp, D), lambda d, i: (0, tc(d, i), 0)),
            pl.BlockSpec((None, n_parts, D, G), lambda d, i: (d, 0, 0, 0)),
            pl.BlockSpec((None, 1, G), lambda d, i: (d, 0, 0)),
            pl.BlockSpec((None, H, G), lambda d, i: (d, 0, 0)),
        ],
        out_specs=pl.BlockSpec((None, C * Bp, H), lambda d, i: (d, tc(d, i), 0)),
        scratch_shapes=[
            pltpu.VMEM((C * Bp, G), jnp.float32),   # chunk gates
            pltpu.VMEM((Bp, H), jnp.float32),       # h carry across chunks
            pltpu.VMEM((Bp, H), jnp.float32),       # c carry across chunks
        ],
        compiler_params=pltpu.CompilerParams(
            dimension_semantics=("parallel", "arbitrary"),
            vmem_limit_bytes=_VMEM_LIMIT),
        cost_estimate=pl.CostEstimate(
            flops=flops, transcendentals=2 * T * Bp * 5 * H,
            bytes_accessed=bytes_accessed),
    )(x_parts, w_ih, b, w_hh)


# ---------------------- fused Linear -> ReLU -> Linear kernel ------------------

def _ff_kernel(x_ref, w1_ref, b1_ref, w2_ref, b2_ref, o_ref):
    h = jnp.dot(x_ref[0], w1_ref[0], preferred_element_type=jnp.float32)
    h = h + jnp.dot(x_ref[1], w1_ref[1], preferred_element_type=jnp.float32)
    h = jnp.maximum(h + b1_ref[...], 0.0)
    o_ref[...] = (jnp.dot(h, w2_ref[...], preferred_element_type=jnp.float32)
                  + b2_ref[...])


def two_ff(x_parts, w1, b1, w2p, b2p, *, max_rows=512):
    """x_parts: (2, N, H) split-K input; returns lane-dense (N, Opad)."""
    _, N, H = x_parts.shape
    F1 = w1.shape[-1]
    Op = w2p.shape[-1]
    bn = min(max_rows, N)
    Np = ((N + bn - 1) // bn) * bn
    xp = (jnp.pad(x_parts, ((0, 0), (0, Np - N), (0, 0)))
          if Np != N else x_parts)

    out = pl.pallas_call(
        _ff_kernel,
        out_shape=jax.ShapeDtypeStruct((Np, Op), jnp.float32),
        grid=(Np // bn,),
        in_specs=[
            pl.BlockSpec((2, bn, H), lambda r: (0, r, 0)),
            pl.BlockSpec((2, H, F1), lambda r: (0, 0, 0)),
            pl.BlockSpec((1, F1), lambda r: (0, 0)),
            pl.BlockSpec((F1, Op), lambda r: (0, 0)),
            pl.BlockSpec((1, Op), lambda r: (0, 0)),
        ],
        out_specs=pl.BlockSpec((bn, Op), lambda r: (r, 0)),
        compiler_params=pltpu.CompilerParams(
            dimension_semantics=("parallel",),
            vmem_limit_bytes=_VMEM_LIMIT),
        cost_estimate=pl.CostEstimate(
            flops=2 * Np * (2 * H * F1 + F1 * Op) + Np * F1,
            transcendentals=0,
            bytes_accessed=4 * (2 * Np * H + 2 * H * F1 + F1 * Op + Np * Op)),
    )(xp, w1, b1, w2p, b2p)
    return out[:N] if Np != N else out


# ------------------------------ parameters --------------------------------------

def init_torch_params(key, num_layers, in_dims, hidden_dims, out_dims):
    """PyTorch-layout parameters (nn.LSTM gate order [i, f, g, o])."""
    H = hidden_dims
    k = 1.0 / math.sqrt(H)

    def uni(kk, shape, bound):
        return jax.random.uniform(kk, shape, jnp.float32, -bound, bound)

    p = {"lstm": []}
    for layer in range(num_layers):
        D = in_dims if layer == 0 else 2 * H
        key, *ks = jax.random.split(key, 9)
        p["lstm"].append({
            "w_ih_f": uni(ks[0], (4 * H, D), k),
            "w_hh_f": uni(ks[1], (4 * H, H), k),
            "b_f": uni(ks[2], (4 * H,), k) + uni(ks[3], (4 * H,), k),
            "w_ih_b": uni(ks[4], (4 * H, D), k),
            "w_hh_b": uni(ks[5], (4 * H, H), k),
            "b_b": uni(ks[6], (4 * H,), k) + uni(ks[7], (4 * H,), k),
        })
    key, k1, k2, k3, k4, k5, k6 = jax.random.split(key, 7)
    kf1 = 1.0 / math.sqrt(2 * H)
    kf2 = 1.0 / math.sqrt(H)
    p["ff1_w"] = uni(k1, (H, 2 * H), kf1)
    p["ff1_b"] = uni(k2, (H,), kf1)
    p["ff2_w"] = uni(k3, (out_dims, H), kf2)
    p["ff2_b"] = uni(k4, (out_dims,), kf2)
    # final_proj: present in the PyTorch module, unused in forward()
    p["fp_w"] = uni(k5, (out_dims, 2 * H), kf1)
    p["fp_b"] = uni(k6, (out_dims,), kf1)
    return p


def _reorder_ifog(a, axis):
    """PyTorch gate blocks [i, f, g, o] -> kernel order [i, f, o, g]."""
    H = a.shape[axis] // 4
    idx = jnp.concatenate([jnp.arange(0, 2 * H),
                           jnp.arange(3 * H, 4 * H),
                           jnp.arange(2 * H, 3 * H)])
    return jnp.take(a, idx, axis=axis)


def prep_kernel_params(tp, num_layers, in_dims, hidden_dims, out_dims,
                       lane_pad=128):
    """Stack / reorder / transpose parameters into the kernel layout."""
    H = hidden_dims
    kp = {"lstm": []}
    for layer in range(num_layers):
        lp = tp["lstm"][layer]
        n_parts = 1 if layer == 0 else 2
        d_part = in_dims if layer == 0 else H
        w_ih_dirs, w_hh_dirs, b_dirs = [], [], []
        for (w_ih, w_hh, b) in ((lp["w_ih_f"], lp["w_hh_f"], lp["b_f"]),
                                (lp["w_ih_b"], lp["w_hh_b"], lp["b_b"])):
            w_ih_r = _reorder_ifog(w_ih, 0)                    # (4H, n_parts*d)
            w_hh_r = _reorder_ifog(w_hh, 0)                    # (4H, H)
            b_r = _reorder_ifog(b, 0)                          # (4H,)
            w_ih_dirs.append(w_ih_r.T.reshape(n_parts, d_part, 4 * H))
            w_hh_dirs.append(w_hh_r.T)
            b_dirs.append(b_r.reshape(1, 4 * H))
        kp["lstm"].append({
            "w_ih": jnp.stack(w_ih_dirs),   # (2, n_parts, d_part, 4H)
            "w_hh": jnp.stack(w_hh_dirs),   # (2, H, 4H)
            "b": jnp.stack(b_dirs),         # (2, 1, 4H)
        })
    # FF1: torch (H, 2H) -> split-K over the fwd/bwd parts.
    w1 = tp["ff1_w"]
    kp["ff1_w"] = jnp.stack([w1[:, :H].T, w1[:, H:].T])        # (2, H, H)
    kp["ff1_b"] = tp["ff1_b"].reshape(1, H)
    # FF2: torch (out, H) -> (H, out) padded to a lane-dense 128-wide output.
    Op = ((out_dims + lane_pad - 1) // lane_pad) * lane_pad
    kp["ff2_w"] = jnp.pad(tp["ff2_w"].T, ((0, 0), (0, Op - out_dims)))
    kp["ff2_b"] = jnp.pad(tp["ff2_b"].reshape(1, -1),
                          ((0, 0), (0, Op - out_dims)))
    return kp


# ------------------------------ forward (Pallas) --------------------------------

def bilstm_twoff_forward(feat, kp, *, num_layers, hidden_dims, out_dims,
                         chunk_target=64):
    T, B, Din = feat.shape
    H = hidden_dims
    Bp = ((B + 7) // 8) * 8              # pad batch to the f32 sublane width
    x = jnp.pad(feat, ((0, 0), (0, Bp - B), (0, 0))) if Bp != B else feat
    x_parts = x.reshape(1, T * Bp, Din)  # single input part for layer 0

    for layer in range(num_layers):
        lp = kp["lstm"][layer]
        x_parts = bilstm_layer(x_parts, lp["w_ih"], lp["b"], lp["w_hh"],
                               T=T, Bp=Bp, H=H, chunk_target=chunk_target)

    out = two_ff(x_parts, kp["ff1_w"], kp["ff1_b"], kp["ff2_w"], kp["ff2_b"])
    out = out[:, :out_dims].reshape(T, Bp, out_dims)
    return out[:, :B]


# ------------------------------ pure-JAX reference ------------------------------

def _lstm_ref_dir(x, w_ih, w_hh, b, reverse):
    H = w_hh.shape[1]
    xs = x[::-1] if reverse else x

    def step(carry, xt):
        h, c = carry
        gates = xt @ w_ih.T + h @ w_hh.T + b
        i_g = jax.nn.sigmoid(gates[:, :H])
        f_g = jax.nn.sigmoid(gates[:, H:2 * H])
        g_g = jnp.tanh(gates[:, 2 * H:3 * H])
        o_g = jax.nn.sigmoid(gates[:, 3 * H:])
        c = f_g * c + i_g * g_g
        h = o_g * jnp.tanh(c)
        return (h, c), h

    z = jnp.zeros((x.shape[1], H), jnp.float32)
    _, hs = jax.lax.scan(step, (z, z), xs)
    return hs[::-1] if reverse else hs


def bilstm_twoff_ref(feat, tp, num_layers, hidden_dims):
    x = feat
    for layer in range(num_layers):
        lp = tp["lstm"][layer]
        fwd = _lstm_ref_dir(x, lp["w_ih_f"], lp["w_hh_f"], lp["b_f"], False)
        bwd = _lstm_ref_dir(x, lp["w_ih_b"], lp["w_hh_b"], lp["b_b"], True)
        x = jnp.concatenate([fwd, bwd], axis=-1)
    h = jnp.maximum(x @ tp["ff1_w"].T + tp["ff1_b"], 0.0)
    return h @ tp["ff2_w"].T + tp["ff2_b"]


# ------------------------------------ main ---------------------------------------

if __name__ == "__main__":
    num_layers = 2
    in_dims = 16
    hidden_dims = 32
    out_dims = 8
    T, B = 8, 4

    key = jax.random.PRNGKey(0)
    key, pkey, xkey = jax.random.split(key, 3)
    tp = init_torch_params(pkey, num_layers, in_dims, hidden_dims, out_dims)
    kp = prep_kernel_params(tp, num_layers, in_dims, hidden_dims, out_dims)
    feat = jax.random.normal(xkey, (T, B, in_dims), jnp.float32)

    fwd_fn = jax.jit(functools.partial(
        bilstm_twoff_forward, num_layers=num_layers,
        hidden_dims=hidden_dims, out_dims=out_dims))
    out = jax.block_until_ready(fwd_fn(feat, kp))

    ref = bilstm_twoff_ref(feat, tp, num_layers, hidden_dims)
    assert out.shape == (T, B, out_dims), out.shape
    max_err = float(jnp.max(jnp.abs(out - ref)))
    assert max_err < 1e-3, f"mismatch vs reference: {max_err}"

    print("KERNEL_OK")
</pallas_src>

<mosaic_0001>
module attributes {stable_mosaic.version = 11 : i64} {
  func.func @_ff_kernel(%arg0: i32, %arg1: memref<2x64x32xf32, #tpu.memory_space<vmem>>, %arg2: memref<2x32x32xf32, #tpu.memory_space<vmem>>, %arg3: memref<1x32xf32, #tpu.memory_space<vmem>>, %arg4: memref<32x128xf32, #tpu.memory_space<vmem>>, %arg5: memref<1x128xf32, #tpu.memory_space<vmem>>, %arg6: memref<64x128xf32, #tpu.memory_space<vmem>>) attributes {dimension_semantics = [#tpu.dimension_semantics<parallel>], iteration_bounds = array<i64: 1>, scalar_prefetch = 0 : i64, scratch_operands = 0 : i64, tpu.core_type = #tpu.core_type<tc>, window_params = [{transform_indices = @transform_0, window_bounds = array<i64: 2, 64, 32>}, {pipeline_mode = #tpu.pipeline_mode<synchronous>, transform_indices = @transform_1, window_bounds = array<i64: 2, 32, 32>}, {pipeline_mode = #tpu.pipeline_mode<synchronous>, transform_indices = @transform_2, window_bounds = array<i64: 1, 32>}, {pipeline_mode = #tpu.pipeline_mode<synchronous>, transform_indices = @transform_3, window_bounds = array<i64: 32, 128>}, {pipeline_mode = #tpu.pipeline_mode<synchronous>, transform_indices = @transform_4, window_bounds = array<i64: 1, 128>}, {transform_indices = @transform_5, window_bounds = array<i64: 64, 128>}]} {
    %c0 = arith.constant 0 : index
    %c0_0 = arith.constant 0 : index
    %c0_1 = arith.constant 0 : index
    %0 = vector.load %arg1[%c0, %c0_0, %c0_1] : memref<2x64x32xf32, #tpu.memory_space<vmem>>, vector<1x64x32xf32>
    %1 = vector.shape_cast %0 : vector<1x64x32xf32> to vector<64x32xf32>
    %c0_2 = arith.constant 0 : index
    %c0_3 = arith.constant 0 : index
    %c0_4 = arith.constant 0 : index
    %2 = vector.load %arg2[%c0_2, %c0_3, %c0_4] : memref<2x32x32xf32, #tpu.memory_space<vmem>>, vector<1x32x32xf32>
    %3 = vector.shape_cast %2 : vector<1x32x32xf32> to vector<32x32xf32>
    %cst = arith.constant dense<0.000000e+00> : vector<64x32xf32>
    %4 = tpu.matmul %1, %3, %cst {dimension_numbers = #tpu.dot_dimension_numbers<[1], [0], [0], [1], [0, 0, 1, 1], [], []>} : vector<64x32xf32>, vector<32x32xf32>, vector<64x32xf32> -> vector<64x32xf32>
    %c1 = arith.constant 1 : index
    %c0_5 = arith.constant 0 : index
    %c0_6 = arith.constant 0 : index
    %5 = vector.load %arg1[%c1, %c0_5, %c0_6] : memref<2x64x32xf32, #tpu.memory_space<vmem>>, vector<1x64x32xf32>
    %6 = vector.shape_cast %5 : vector<1x64x32xf32> to vector<64x32xf32>
    %c1_7 = arith.constant 1 : index
    %c0_8 = arith.constant 0 : index
    %c0_9 = arith.constant 0 : index
    %7 = vector.load %arg2[%c1_7, %c0_8, %c0_9] : memref<2x32x32xf32, #tpu.memory_space<vmem>>, vector<1x32x32xf32>
    %8 = vector.shape_cast %7 : vector<1x32x32xf32> to vector<32x32xf32>
    %cst_10 = arith.constant dense<0.000000e+00> : vector<64x32xf32>
    %9 = tpu.matmul %6, %8, %cst_10 {dimension_numbers = #tpu.dot_dimension_numbers<[1], [0], [0], [1], [0, 0, 1, 1], [], []>} : vector<64x32xf32>, vector<32x32xf32>, vector<64x32xf32> -> vector<64x32xf32>
    %10 = arith.addf %4, %9 : vector<64x32xf32>
    %c0_11 = arith.constant 0 : index
    %c0_12 = arith.constant 0 : index
    %11 = vector.load %arg3[%c0_11, %c0_12] : memref<1x32xf32, #tpu.memory_space<vmem>>, vector<1x32xf32>
    %12 = vector.broadcast %11 : vector<1x32xf32> to vector<64x32xf32>
    %13 = arith.addf %10, %12 : vector<64x32xf32>
    %cst_13 = arith.constant 0.000000e+00 : f32
    %14 = vector.broadcast %cst_13 : f32 to vector<64x32xf32>
    %15 = arith.maximumf %13, %14 : vector<64x32xf32>
    %c0_14 = arith.constant 0 : index
    %c0_15 = arith.constant 0 : index
    %16 = vector.load %arg4[%c0_14, %c0_15] : memref<32x128xf32, #tpu.memory_space<vmem>>, vector<32x128xf32>
    %cst_16 = arith.constant dense<0.000000e+00> : vector<64x128xf32>
    %17 = tpu.matmul %15, %16, %cst_16 {dimension_numbers = #tpu.dot_dimension_numbers<[1], [0], [0], [1], [0, 0, 1, 1], [], []>} : vector<64x32xf32>, vector<32x128xf32>, vector<64x128xf32> -> vector<64x128xf32>
    %c0_17 = arith.constant 0 : index
    %c0_18 = arith.constant 0 : index
    %18 = vector.load %arg5[%c0_17, %c0_18] : memref<1x128xf32, #tpu.memory_space<vmem>>, vector<1x128xf32>
    %19 = vector.broadcast %18 : vector<1x128xf32> to vector<64x128xf32>
    %20 = arith.addf %17, %19 : vector<64x128xf32>
    %c0_19 = arith.constant 0 : index
    %c0_20 = arith.constant 0 : index
    %21 = vector.load %arg6[%c0_19, %c0_20] : memref<64x128xf32, #tpu.memory_space<vmem>>, vector<64x128xf32>
    tpu.vector_store %arg6[%c0_19, %c0_20], %20 {strides = array<i32>} : memref<64x128xf32, #tpu.memory_space<vmem>>, vector<64x128xf32>,
    return
  }
  func.func @transform_0(%arg0: i32) -> (i32, i32, i32) {
    %c0_i32 = arith.constant 0 : i32
    %c0_i32_0 = arith.constant 0 : i32
    %c0_i32_1 = arith.constant 0 : i32
    return %c0_i32, %arg0, %c0_i32_0 : i32, i32, i32
  }
  func.func @transform_1(%arg0: i32) -> (i32, i32, i32) {
    %c0_i32 = arith.constant 0 : i32
    %c0_i32_0 = arith.constant 0 : i32
    %c0_i32_1 = arith.constant 0 : i32
    %c0_i32_2 = arith.constant 0 : i32
    return %c0_i32, %c0_i32_0, %c0_i32_1 : i32, i32, i32
  }
  func.func @transform_2(%arg0: i32) -> (i32, i32) {
    %c0_i32 = arith.constant 0 : i32
    %c0_i32_0 = arith.constant 0 : i32
    %c0_i32_1 = arith.constant 0 : i32
    return %c0_i32, %c0_i32_0 : i32, i32
  }
  func.func @transform_3(%arg0: i32) -> (i32, i32) {
    %c0_i32 = arith.constant 0 : i32
    %c0_i32_0 = arith.constant 0 : i32
    %c0_i32_1 = arith.constant 0 : i32
    return %c0_i32, %c0_i32_0 : i32, i32
  }
  func.func @transform_4(%arg0: i32) -> (i32, i32) {
    %c0_i32 = arith.constant 0 : i32
    %c0_i32_0 = arith.constant 0 : i32
    %c0_i32_1 = arith.constant 0 : i32
    return %c0_i32, %c0_i32_0 : i32, i32
  }
  func.func @transform_5(%arg0: i32) -> (i32, i32) {
    %c0_i32 = arith.constant 0 : i32
    %c0_i32_0 = arith.constant 0 : i32
    return %arg0, %c0_i32 : i32, i32
  }
}

module attributes {stable_mosaic.version = 11 : i64} {
  func.func @_bilstm_dir_kernel(%arg0: i32, %arg1: i32, %arg2: memref<1x64x16xf32, #tpu.memory_space<vmem>>, %arg3: memref<1x1x16x128xf32, #tpu.memory_space<vmem>>, %arg4: memref<1x1x128xf32, #tpu.memory_space<vmem>>, %arg5: memref<1x32x128xf32, #tpu.memory_space<vmem>>, %arg6: memref<1x64x32xf32, #tpu.memory_space<vmem>>, %arg7: memref<64x128xf32, #tpu.memory_space<vmem>>, %arg8: memref<8x32xf32, #tpu.memory_space<vmem>>, %arg9: memref<8x32xf32, #tpu.memory_space<vmem>>) attributes {dimension_semantics = [#tpu.dimension_semantics<parallel>, #tpu.dimension_semantics<arbitrary>], iteration_bounds = array<i64: 2, 1>, scalar_prefetch = 0 : i64, scratch_operands = 3 : i64, tpu.core_type = #tpu.core_type<tc>, window_params = [{transform_indices = @transform_0, window_bounds = array<i64: 1, 64, 16>}, {transform_indices = @transform_1, window_bounds = array<i64: 1, 1, 16, 128>}, {transform_indices = @transform_2, window_bounds = array<i64: 1, 1, 128>}, {transform_indices = @transform_3, window_bounds = array<i64: 1, 32, 128>}, {transform_indices = @transform_4, window_bounds = array<i64: 1, 64, 32>}]} {
    %c0 = arith.constant 0 : index
    %c0_0 = arith.constant 0 : index
    %c0_1 = arith.constant 0 : index
    %0 = vector.load %arg2[%c0, %c0_0, %c0_1] : memref<1x64x16xf32, #tpu.memory_space<vmem>>, vector<1x64x16xf32>
    %1 = vector.shape_cast %0 : vector<1x64x16xf32> to vector<64x16xf32>
    %c0_2 = arith.constant 0 : index
    %c0_3 = arith.constant 0 : index
    %c0_4 = arith.constant 0 : index
    %c0_5 = arith.constant 0 : index
    %2 = vector.load %arg3[%c0_2, %c0_3, %c0_4, %c0_5] : memref<1x1x16x128xf32, #tpu.memory_space<vmem>>, vector<1x1x16x128xf32>
    %3 = vector.shape_cast %2 : vector<1x1x16x128xf32> to vector<16x128xf32>
    %cst = arith.constant dense<0.000000e+00> : vector<64x128xf32>
    %4 = tpu.matmul %1, %3, %cst {dimension_numbers = #tpu.dot_dimension_numbers<[1], [0], [0], [1], [0, 0, 1, 1], [], []>} : vector<64x16xf32>, vector<16x128xf32>, vector<64x128xf32> -> vector<64x128xf32>
    %c0_6 = arith.constant 0 : index
    %c0_7 = arith.constant 0 : index
    %c0_8 = arith.constant 0 : index
    %5 = vector.load %arg4[%c0_6, %c0_7, %c0_8] : memref<1x1x128xf32, #tpu.memory_space<vmem>>, vector<1x1x128xf32>
    %6 = vector.shape_cast %5 : vector<1x1x128xf32> to vector<1x128xf32>
    %7 = vector.broadcast %6 : vector<1x128xf32> to vector<64x128xf32>
    %8 = arith.addf %4, %7 : vector<64x128xf32>
    %c0_9 = arith.constant 0 : index
    %c0_10 = arith.constant 0 : index
    %9 = vector.load %arg7[%c0_9, %c0_10] : memref<64x128xf32, #tpu.memory_space<vmem>>, vector<64x128xf32>
    tpu.vector_store %arg7[%c0_9, %c0_10], %8 {strides = array<i32>} : memref<64x128xf32, #tpu.memory_space<vmem>>, vector<64x128xf32>,
    %c0_11 = arith.constant 0 : index
    %c0_12 = arith.constant 0 : index
    %c0_13 = arith.constant 0 : index
    %10 = vector.load %arg5[%c0_11, %c0_12, %c0_13] : memref<1x32x128xf32, #tpu.memory_space<vmem>>, vector<1x32x128xf32>
    %11 = vector.shape_cast %10 : vector<1x32x128xf32> to vector<32x128xf32>
    %c0_i32 = arith.constant 0 : i32
    %12 = arith.cmpi eq, %arg1, %c0_i32 : i32
    %13 = arith.extui %12 : i1 to i32
    %c0_i32_14 = arith.constant 0 : i32
    %14 = arith.cmpi ne, %13, %c0_i32_14 : i32
    scf.if %14 {
      %cst_88 = arith.constant 0.000000e+00 : f32
      %251 = vector.broadcast %cst_88 : f32 to vector<8x32xf32>
      %c0_89 = arith.constant 0 : index
      %c0_90 = arith.constant 0 : index
      %252 = vector.load %arg8[%c0_89, %c0_90] : memref<8x32xf32, #tpu.memory_space<vmem>>, vector<8x32xf32>
      tpu.vector_store %arg8[%c0_89, %c0_90], %251 {strides = array<i32>} : memref<8x32xf32, #tpu.memory_space<vmem>>, vector<8x32xf32>,
      %cst_91 = arith.constant 0.000000e+00 : f32
      %253 = vector.broadcast %cst_91 : f32 to vector<8x32xf32>
      %c0_92 = arith.constant 0 : index
      %c0_93 = arith.constant 0 : index
      %254 = vector.load %arg9[%c0_92, %c0_93] : memref<8x32xf32, #tpu.memory_space<vmem>>, vector<8x32xf32>
      tpu.vector_store %arg9[%c0_92, %c0_93], %253 {strides = array<i32>} : memref<8x32xf32, #tpu.memory_space<vmem>>, vector<8x32xf32>,
    } else {
    }
    %c0_15 = arith.constant 0 : index
    %c0_16 = arith.constant 0 : index
    %15 = vector.load %arg8[%c0_15, %c0_16] : memref<8x32xf32, #tpu.memory_space<vmem>>, vector<8x32xf32>
    %c0_17 = arith.constant 0 : index
    %c0_18 = arith.constant 0 : index
    %16 = vector.load %arg9[%c0_17, %c0_18] : memref<8x32xf32, #tpu.memory_space<vmem>>, vector<8x32xf32>
    %c0_i32_19 = arith.constant 0 : i32
    %c0_i32_20 = arith.constant 0 : i32
    %17 = arith.cmpi eq, %arg0, %c0_i32_20 : i32
    %c7_i32 = arith.constant 7 : i32
    %18 = arith.subi %c7_i32, %c0_i32_19 : i32
    %19 = arith.select %17, %c0_i32_19, %18 : i32
    %c8_i32 = arith.constant 8 : i32
    %20 = arith.muli %19, %c8_i32 : i32
    %21 = tpu.assume_multiple %20, 8 : i32
    %22 = arith.index_cast %21 : i32 to index
    %c0_21 = arith.constant 0 : index
    %23 = vector.load %arg7[%22, %c0_21] : memref<64x128xf32, #tpu.memory_space<vmem>>, vector<8x128xf32>
    %cst_22 = arith.constant dense<0.000000e+00> : vector<8x128xf32>
    %24 = tpu.matmul %15, %11, %cst_22 {dimension_numbers = #tpu.dot_dimension_numbers<[1], [0], [0], [1], [0, 0, 1, 1], [], []>} : vector<8x32xf32>, vector<32x128xf32>, vector<8x128xf32> -> vector<8x128xf32>
    %25 = arith.addf %23, %24 : vector<8x128xf32>
    %26 = vector.extract_strided_slice %25 {offsets = [0, 0], sizes = [8, 96], strides = [1, 1]} : vector<8x128xf32> to vector<8x96xf32>
    %27 = arith.negf %26 : vector<8x96xf32>
    %28 = math.exp %27 : vector<8x96xf32>
    %cst_23 = arith.constant 1.000000e+00 : f32
    %29 = vector.broadcast %cst_23 : f32 to vector<8x96xf32>
    %30 = arith.addf %29, %28 : vector<8x96xf32>
    %31 = arith.divf %29, %30 : vector<8x96xf32>
    %32 = vector.extract_strided_slice %25 {offsets = [0, 96], sizes = [8, 32], strides = [1, 1]} : vector<8x128xf32> to vector<8x32xf32>
    %33 = math.tanh %32 : vector<8x32xf32>
    %34 = vector.extract_strided_slice %31 {offsets = [0, 32], sizes = [8, 32], strides = [1, 1]} : vector<8x96xf32> to vector<8x32xf32>
    %35 = arith.mulf %34, %16 : vector<8x32xf32>
    %36 = vector.extract_strided_slice %31 {offsets = [0, 0], sizes = [8, 32], strides = [1, 1]} : vector<8x96xf32> to vector<8x32xf32>
    %37 = arith.mulf %36, %33 : vector<8x32xf32>
    %38 = arith.addf %35, %37 : vector<8x32xf32>
    %39 = vector.extract_strided_slice %31 {offsets = [0, 64], sizes = [8, 32], strides = [1, 1]} : vector<8x96xf32> to vector<8x32xf32>
    %40 = math.tanh %38 : vector<8x32xf32>
    %41 = arith.mulf %39, %40 : vector<8x32xf32>
    %c0_24 = arith.constant 0 : index
    %42 = arith.index_cast %21 : i32 to index
    %c0_25 = arith.constant 0 : index
    %43 = vector.load %arg6[%c0_24, %42, %c0_25] : memref<1x64x32xf32, #tpu.memory_space<vmem>>, vector<1x8x32xf32>
    %44 = vector.shape_cast %43 : vector<1x8x32xf32> to vector<8x32xf32>
    %45 = vector.shape_cast %41 : vector<8x32xf32> to vector<1x8x32xf32>
    tpu.vector_store %arg6[%c0_24, %42, %c0_25], %45 {strides = array<i32>} : memref<1x64x32xf32, #tpu.memory_space<vmem>>, vector<1x8x32xf32>,
    %c1_i32 = arith.constant 1 : i32
    %c0_i32_26 = arith.constant 0 : i32
    %46 = arith.cmpi eq, %arg0, %c0_i32_26 : i32
    %c7_i32_27 = arith.constant 7 : i32
    %47 = arith.subi %c7_i32_27, %c1_i32 : i32
    %48 = arith.select %46, %c1_i32, %47 : i32
    %c8_i32_28 = arith.constant 8 : i32
    %49 = arith.muli %48, %c8_i32_28 : i32
    %50 = tpu.assume_multiple %49, 8 : i32
    %51 = arith.index_cast %50 : i32 to index
    %c0_29 = arith.constant 0 : index
    %52 = vector.load %arg7[%51, %c0_29] : memref<64x128xf32, #tpu.memory_space<vmem>>, vector<8x128xf32>
    %cst_30 = arith.constant dense<0.000000e+00> : vector<8x128xf32>
    %53 = tpu.matmul %41, %11, %cst_30 {dimension_numbers = #tpu.dot_dimension_numbers<[1], [0], [0], [1], [0, 0, 1, 1], [], []>} : vector<8x32xf32>, vector<32x128xf32>, vector<8x128xf32> -> vector<8x128xf32>
    %54 = arith.addf %52, %53 : vector<8x128xf32>
    %55 = vector.extract_strided_slice %54 {offsets = [0, 0], sizes = [8, 96], strides = [1, 1]} : vector<8x128xf32> to vector<8x96xf32>
    %56 = arith.negf %55 : vector<8x96xf32>
    %57 = math.exp %56 : vector<8x96xf32>
    %cst_31 = arith.constant 1.000000e+00 : f32
    %58 = vector.broadcast %cst_31 : f32 to vector<8x96xf32>
    %59 = arith.addf %58, %57 : vector<8x96xf32>
    %60 = arith.divf %58, %59 : vector<8x96xf32>
    %61 = vector.extract_strided_slice %54 {offsets = [0, 96], sizes = [8, 32], strides = [1, 1]} : vector<8x128xf32> to vector<8x32xf32>
    %62 = math.tanh %61 : vector<8x32xf32>
    %63 = vector.extract_strided_slice %60 {offsets = [0, 32], sizes = [8, 32], strides = [1, 1]} : vector<8x96xf32> to vector<8x32xf32>
    %64 = arith.mulf %63, %38 : vector<8x32xf32>
    %65 = vector.extract_strided_slice %60 {offsets = [0, 0], sizes = [8, 32], strides = [1, 1]} : vector<8x96xf32> to vector<8x32xf32>
    %66 = arith.mulf %65, %62 : vector<8x32xf32>
    %67 = arith.addf %64, %66 : vector<8x32xf32>
    %68 = vector.extract_strided_slice %60 {offsets = [0, 64], sizes = [8, 32], strides = [1, 1]} : vector<8x96xf32> to vector<8x32xf32>
    %69 = math.tanh %67 : vector<8x32xf32>
    %70 = arith.mulf %68, %69 : vector<8x32xf32>
    %c0_32 = arith.constant 0 : index
    %71 = arith.index_cast %50 : i32 to index
    %c0_33 = arith.constant 0 : index
    %72 = vector.load %arg6[%c0_32, %71, %c0_33] : memref<1x64x32xf32, #tpu.memory_space<vmem>>, vector<1x8x32xf32>
    %73 = vector.shape_cast %72 : vector<1x8x32xf32> to vector<8x32xf32>
    %74 = vector.shape_cast %70 : vector<8x32xf32> to vector<1x8x32xf32>
    tpu.vector_store %arg6[%c0_32, %71, %c0_33], %74 {strides = array<i32>} : memref<1x64x32xf32, #tpu.memory_space<vmem>>, vector<1x8x32xf32>,
    %c2_i32 = arith.constant 2 : i32
    %c0_i32_34 = arith.constant 0 : i32
    %75 = arith.cmpi eq, %arg0, %c0_i32_34 : i32
    %c7_i32_35 = arith.constant 7 : i32
    %76 = arith.subi %c7_i32_35, %c2_i32 : i32
    %77 = arith.select %75, %c2_i32, %76 : i32
    %c8_i32_36 = arith.constant 8 : i32
    %78 = arith.muli %77, %c8_i32_36 : i32
    %79 = tpu.assume_multiple %78, 8 : i32
    %80 = arith.index_cast %79 : i32 to index
    %c0_37 = arith.constant 0 : index
    %81 = vector.load %arg7[%80, %c0_37] : memref<64x128xf32, #tpu.memory_space<vmem>>, vector<8x128xf32>
    %cst_38 = arith.constant dense<0.000000e+00> : vector<8x128xf32>
    %82 = tpu.matmul %70, %11, %cst_38 {dimension_numbers = #tpu.dot_dimension_numbers<[1], [0], [0], [1], [0, 0, 1, 1], [], []>} : vector<8x32xf32>, vector<32x128xf32>, vector<8x128xf32> -> vector<8x128xf32>
    %83 = arith.addf %81, %82 : vector<8x128xf32>
    %84 = vector.extract_strided_slice %83 {offsets = [0, 0], sizes = [8, 96], strides = [1, 1]} : vector<8x128xf32> to vector<8x96xf32>
    %85 = arith.negf %84 : vector<8x96xf32>
    %86 = math.exp %85 : vector<8x96xf32>
    %cst_39 = arith.constant 1.000000e+00 : f32
    %87 = vector.broadcast %cst_39 : f32 to vector<8x96xf32>
    %88 = arith.addf %87, %86 : vector<8x96xf32>
    %89 = arith.divf %87, %88 : vector<8x96xf32>
    %90 = vector.extract_strided_slice %83 {offsets = [0, 96], sizes = [8, 32], strides = [1, 1]} : vector<8x128xf32> to vector<8x32xf32>
    %91 = math.tanh %90 : vector<8x32xf32>
    %92 = vector.extract_strided_slice %89 {offsets = [0, 32], sizes = [8, 32], strides = [1, 1]} : vector<8x96xf32> to vector<8x32xf32>
    %93 = arith.mulf %92, %67 : vector<8x32xf32>
    %94 = vector.extract_strided_slice %89 {offsets = [0, 0], sizes = [8, 32], strides = [1, 1]} : vector<8x96xf32> to vector<8x32xf32>
    %95 = arith.mulf %94, %91 : vector<8x32xf32>
    %96 = arith.addf %93, %95 : vector<8x32xf32>
    %97 = vector.extract_strided_slice %89 {offsets = [0, 64], sizes = [8, 32], strides = [1, 1]} : vector<8x96xf32> to vector<8x32xf32>
    %98 = math.tanh %96 : vector<8x32xf32>
    %99 = arith.mulf %97, %98 : vector<8x32xf32>
    %c0_40 = arith.constant 0 : index
    %100 = arith.index_cast %79 : i32 to index
    %c0_41 = arith.constant 0 : index
    %101 = vector.load %arg6[%c0_40, %100, %c0_41] : memref<1x64x32xf32, #tpu.memory_space<vmem>>, vector<1x8x32xf32>
    %102 = vector.shape_cast %101 : vector<1x8x32xf32> to vector<8x32xf32>
    %103 = vector.shape_cast %99 : vector<8x32xf32> to vector<1x8x32xf32>
    tpu.vector_store %arg6[%c0_40, %100, %c0_41], %103 {strides = array<i32>} : memref<1x64x32xf32, #tpu.memory_space<vmem>>, vector<1x8x32xf32>,
    %c3_i32 = arith.constant 3 : i32
    %c0_i32_42 = arith.constant 0 : i32
    %104 = arith.cmpi eq, %arg0, %c0_i32_42 : i32
    %c7_i32_43 = arith.constant 7 : i32
    %105 = arith.subi %c7_i32_43, %c3_i32 : i32
    %106 = arith.select %104, %c3_i32, %105 : i32
    %c8_i32_44 = arith.constant 8 : i32
    %107 = arith.muli %106, %c8_i32_44 : i32
    %108 = tpu.assume_multiple %107, 8 : i32
    %109 = arith.index_cast %108 : i32 to index
    %c0_45 = arith.constant 0 : index
    %110 = vector.load %arg7[%109, %c0_45] : memref<64x128xf32, #tpu.memory_space<vmem>>, vector<8x128xf32>
    %cst_46 = arith.constant dense<0.000000e+00> : vector<8x128xf32>
    %111 = tpu.matmul %99, %11, %cst_46 {dimension_numbers = #tpu.dot_dimension_numbers<[1], [0], [0], [1], [0, 0, 1, 1], [], []>} : vector<8x32xf32>, vector<32x128xf32>, vector<8x128xf32> -> vector<8x128xf32>
    %112 = arith.addf %110, %111 : vector<8x128xf32>
    %113 = vector.extract_strided_slice %112 {offsets = [0, 0], sizes = [8, 96], strides = [1, 1]} : vector<8x128xf32> to vector<8x96xf32>
    %114 = arith.negf %113 : vector<8x96xf32>
    %115 = math.exp %114 : vector<8x96xf32>
    %cst_47 = arith.constant 1.000000e+00 : f32
    %116 = vector.broadcast %cst_47 : f32 to vector<8x96xf32>
    %117 = arith.addf %116, %115 : vector<8x96xf32>
    %118 = arith.divf %116, %117 : vector<8x96xf32>
    %119 = vector.extract_strided_slice %112 {offsets = [0, 96], sizes = [8, 32], strides = [1, 1]} : vector<8x128xf32> to vector<8x32xf32>
    %120 = math.tanh %119 : vector<8x32xf32>
    %121 = vector.extract_strided_slice %118 {offsets = [0, 32], sizes = [8, 32], strides = [1, 1]} : vector<8x96xf32> to vector<8x32xf32>
    %122 = arith.mulf %121, %96 : vector<8x32xf32>
    %123 = vector.extract_strided_slice %118 {offsets = [0, 0], sizes = [8, 32], strides = [1, 1]} : vector<8x96xf32> to vector<8x32xf32>
    %124 = arith.mulf %123, %120 : vector<8x32xf32>
    %125 = arith.addf %122, %124 : vector<8x32xf32>
    %126 = vector.extract_strided_slice %118 {offsets = [0, 64], sizes = [8, 32], strides = [1, 1]} : vector<8x96xf32> to vector<8x32xf32>
    %127 = math.tanh %125 : vector<8x32xf32>
    %128 = arith.mulf %126, %127 : vector<8x32xf32>
    %c0_48 = arith.constant 0 : index
    %129 = arith.index_cast %108 : i32 to index
    %c0_49 = arith.constant 0 : index
    %130 = vector.load %arg6[%c0_48, %129, %c0_49] : memref<1x64x32xf32, #tpu.memory_space<vmem>>, vector<1x8x32xf32>
    %131 = vector.shape_cast %130 : vector<1x8x32xf32> to vector<8x32xf32>
    %132 = vector.shape_cast %128 : vector<8x32xf32> to vector<1x8x32xf32>
    tpu.vector_store %arg6[%c0_48, %129, %c0_49], %132 {strides = array<i32>} : memref<1x64x32xf32, #tpu.memory_space<vmem>>, vector<1x8x32xf32>,
    %c4_i32 = arith.constant 4 : i32
    %c0_i32_50 = arith.constant 0 : i32
    %133 = arith.cmpi eq, %arg0, %c0_i32_50 : i32
    %c7_i32_51 = arith.constant 7 : i32
    %134 = arith.subi %c7_i32_51, %c4_i32 : i32
    %135 = arith.select %133, %c4_i32, %134 : i32
    %c8_i32_52 = arith.constant 8 : i32
    %136 = arith.muli %135, %c8_i32_52 : i32
    %137 = tpu.assume_multiple %136, 8 : i32
    %138 = arith.index_cast %137 : i32 to index
    %c0_53 = arith.constant 0 : index
    %139 = vector.load %arg7[%138, %c0_53] : memref<64x128xf32, #tpu.memory_space<vmem>>, vector<8x128xf32>
    %cst_54 = arith.constant dense<0.000000e+00> : vector<8x128xf32>
    %140 = tpu.matmul %128, %11, %cst_54 {dimension_numbers = #tpu.dot_dimension_numbers<[1], [0], [0], [1], [0, 0, 1, 1], [], []>} : vector<8x32xf32>, vector<32x128xf32>, vector<8x128xf32> -> vector<8x128xf32>
    %141 = arith.addf %139, %140 : vector<8x128xf32>
    %142 = vector.extract_strided_slice %141 {offsets = [0, 0], sizes = [8, 96], strides = [1, 1]} : vector<8x128xf32> to vector<8x96xf32>
    %143 = arith.negf %142 : vector<8x96xf32>
    %144 = math.exp %143 : vector<8x96xf32>
    %cst_55 = arith.constant 1.000000e+00 : f32
    %145 = vector.broadcast %cst_55 : f32 to vector<8x96xf32>
    %146 = arith.addf %145, %144 : vector<8x96xf32>
    %147 = arith.divf %145, %146 : vector<8x96xf32>
    %148 = vector.extract_strided_slice %141 {offsets = [0, 96], sizes = [8, 32], strides = [1, 1]} : vector<8x128xf32> to vector<8x32xf32>
    %149 = math.tanh %148 : vector<8x32xf32>
    %150 = vector.extract_strided_slice %147 {offsets = [0, 32], sizes = [8, 32], strides = [1, 1]} : vector<8x96xf32> to vector<8x32xf32>
    %151 = arith.mulf %150, %125 : vector<8x32xf32>
    %152 = vector.extract_strided_slice %147 {offsets = [0, 0], sizes = [8, 32], strides = [1, 1]} : vector<8x96xf32> to vector<8x32xf32>
    %153 = arith.mulf %152, %149 : vector<8x32xf32>
    %154 = arith.addf %151, %153 : vector<8x32xf32>
    %155 = vector.extract_strided_slice %147 {offsets = [0, 64], sizes = [8, 32], strides = [1, 1]} : vector<8x96xf32> to vector<8x32xf32>
    %156 = math.tanh %154 : vector<8x32xf32>
    %157 = arith.mulf %155, %156 : vector<8x32xf32>
    %c0_56 = arith.constant 0 : index
    %158 = arith.index_cast %137 : i32 to index
    %c0_57 = arith.constant 0 : index
    %159 = vector.load %arg6[%c0_56, %158, %c0_57] : memref<1x64x32xf32, #tpu.memory_space<vmem>>, vector<1x8x32xf32>
    %160 = vector.shape_cast %159 : vector<1x8x32xf32> to vector<8x32xf32>
    %161 = vector.shape_cast %157 : vector<8x32xf32> to vector<1x8x32xf32>
    tpu.vector_store %arg6[%c0_56, %158, %c0_57], %161 {strides = array<i32>} : memref<1x64x32xf32, #tpu.memory_space<vmem>>, vector<1x8x32xf32>,
    %c5_i32 = arith.constant 5 : i32
    %c0_i32_58 = arith.constant 0 : i32
    %162 = arith.cmpi eq, %arg0, %c0_i32_58 : i32
    %c7_i32_59 = arith.constant 7 : i32
    %163 = arith.subi %c7_i32_59, %c5_i32 : i32
    %164 = arith.select %162, %c5_i32, %163 : i32
    %c8_i32_60 = arith.constant 8 : i32
    %165 = arith.muli %164, %c8_i32_60 : i32
    %166 = tpu.assume_multiple %165, 8 : i32
    %167 = arith.index_cast %166 : i32 to index
    %c0_61 = arith.constant 0 : index
    %168 = vector.load %arg7[%167, %c0_61] : memref<64x128xf32, #tpu.memory_space<vmem>>, vector<8x128xf32>
    %cst_62 = arith.constant dense<0.000000e+00> : vector<8x128xf32>
    %169 = tpu.matmul %157, %11, %cst_62 {dimension_numbers = #tpu.dot_dimension_numbers<[1], [0], [0], [1], [0, 0, 1, 1], [], []>} : vector<8x32xf32>, vector<32x128xf32>, vector<8x128xf32> -> vector<8x128xf32>
    %170 = arith.addf %168, %169 : vector<8x128xf32>
    %171 = vector.extract_strided_slice %170 {offsets = [0, 0], sizes = [8, 96], strides = [1, 1]} : vector<8x128xf32> to vector<8x96xf32>
    %172 = arith.negf %171 : vector<8x96xf32>
    %173 = math.exp %172 : vector<8x96xf32>
    %cst_63 = arith.constant 1.000000e+00 : f32
    %174 = vector.broadcast %cst_63 : f32 to vector<8x96xf32>
    %175 = arith.addf %174, %173 : vector<8x96xf32>
    %176 = arith.divf %174, %175 : vector<8x96xf32>
    %177 = vector.extract_strided_slice %170 {offsets = [0, 96], sizes = [8, 32], strides = [1, 1]} : vector<8x128xf32> to vector<8x32xf32>
    %178 = math.tanh %177 : vector<8x32xf32>
    %179 = vector.extract_strided_slice %176 {offsets = [0, 32], sizes = [8, 32], strides = [1, 1]} : vector<8x96xf32> to vector<8x32xf32>
    %180 = arith.mulf %179, %154 : vector<8x32xf32>
    %181 = vector.extract_strided_slice %176 {offsets = [0, 0], sizes = [8, 32], strides = [1, 1]} : vector<8x96xf32> to vector<8x32xf32>
    %182 = arith.mulf %181, %178 : vector<8x32xf32>
    %183 = arith.addf %180, %182 : vector<8x32xf32>
    %184 = vector.extract_strided_slice %176 {offsets = [0, 64], sizes = [8, 32], strides = [1, 1]} : vector<8x96xf32> to vector<8x32xf32>
    %185 = math.tanh %183 : vector<8x32xf32>
    %186 = arith.mulf %184, %185 : vector<8x32xf32>
    %c0_64 = arith.constant 0 : index
    %187 = arith.index_cast %166 : i32 to index
    %c0_65 = arith.constant 0 : index
    %188 = vector.load %arg6[%c0_64, %187, %c0_65] : memref<1x64x32xf32, #tpu.memory_space<vmem>>, vector<1x8x32xf32>
    %189 = vector.shape_cast %188 : vector<1x8x32xf32> to vector<8x32xf32>
    %190 = vector.shape_cast %186 : vector<8x32xf32> to vector<1x8x32xf32>
    tpu.vector_store %arg6[%c0_64, %187, %c0_65], %190 {strides = array<i32>} : memref<1x64x32xf32, #tpu.memory_space<vmem>>, vector<1x8x32xf32>,
    %c6_i32 = arith.constant 6 : i32
    %c0_i32_66 = arith.constant 0 : i32
    %191 = arith.cmpi eq, %arg0, %c0_i32_66 : i32
    %c7_i32_67 = arith.constant 7 : i32
    %192 = arith.subi %c7_i32_67, %c6_i32 : i32
    %193 = arith.select %191, %c6_i32, %192 : i32
    %c8_i32_68 = arith.constant 8 : i32
    %194 = arith.muli %193, %c8_i32_68 : i32
    %195 = tpu.assume_multiple %194, 8 : i32
    %196 = arith.index_cast %195 : i32 to index
    %c0_69 = arith.constant 0 : index
    %197 = vector.load %arg7[%196, %c0_69] : memref<64x128xf32, #tpu.memory_space<vmem>>, vector<8x128xf32>
    %cst_70 = arith.constant dense<0.000000e+00> : vector<8x128xf32>
    %198 = tpu.matmul %186, %11, %cst_70 {dimension_numbers = #tpu.dot_dimension_numbers<[1], [0], [0], [1], [0, 0, 1, 1], [], []>} : vector<8x32xf32>, vector<32x128xf32>, vector<8x128xf32> -> vector<8x128xf32>
    %199 = arith.addf %197, %198 : vector<8x128xf32>
    %200 = vector.extract_strided_slice %199 {offsets = [0, 0], sizes = [8, 96], strides = [1, 1]} : vector<8x128xf32> to vector<8x96xf32>
    %201 = arith.negf %200 : vector<8x96xf32>
    %202 = math.exp %201 : vector<8x96xf32>
    %cst_71 = arith.constant 1.000000e+00 : f32
    %203 = vector.broadcast %cst_71 : f32 to vector<8x96xf32>
    %204 = arith.addf %203, %202 : vector<8x96xf32>
    %205 = arith.divf %203, %204 : vector<8x96xf32>
    %206 = vector.extract_strided_slice %199 {offsets = [0, 96], sizes = [8, 32], strides = [1, 1]} : vector<8x128xf32> to vector<8x32xf32>
    %207 = math.tanh %206 : vector<8x32xf32>
    %208 = vector.extract_strided_slice %205 {offsets = [0, 32], sizes = [8, 32], strides = [1, 1]} : vector<8x96xf32> to vector<8x32xf32>
    %209 = arith.mulf %208, %183 : vector<8x32xf32>
    %210 = vector.extract_strided_slice %205 {offsets = [0, 0], sizes = [8, 32], strides = [1, 1]} : vector<8x96xf32> to vector<8x32xf32>
    %211 = arith.mulf %210, %207 : vector<8x32xf32>
    %212 = arith.addf %209, %211 : vector<8x32xf32>
    %213 = vector.extract_strided_slice %205 {offsets = [0, 64], sizes = [8, 32], strides = [1, 1]} : vector<8x96xf32> to vector<8x32xf32>
    %214 = math.tanh %212 : vector<8x32xf32>
    %215 = arith.mulf %213, %214 : vector<8x32xf32>
    %c0_72 = arith.constant 0 : index
    %216 = arith.index_cast %195 : i32 to index
    %c0_73 = arith.constant 0 : index
    %217 = vector.load %arg6[%c0_72, %216, %c0_73] : memref<1x64x32xf32, #tpu.memory_space<vmem>>, vector<1x8x32xf32>
    %218 = vector.shape_cast %217 : vector<1x8x32xf32> to vector<8x32xf32>
    %219 = vector.shape_cast %215 : vector<8x32xf32> to vector<1x8x32xf32>
    tpu.vector_store %arg6[%c0_72, %216, %c0_73], %219 {strides = array<i32>} : memref<1x64x32xf32, #tpu.memory_space<vmem>>, vector<1x8x32xf32>,
    %c7_i32_74 = arith.constant 7 : i32
    %c0_i32_75 = arith.constant 0 : i32
    %220 = arith.cmpi eq, %arg0, %c0_i32_75 : i32
    %c7_i32_76 = arith.constant 7 : i32
    %221 = arith.subi %c7_i32_76, %c7_i32_74 : i32
    %222 = arith.select %220, %c7_i32_74, %221 : i32
    %c8_i32_77 = arith.constant 8 : i32
    %223 = arith.muli %222, %c8_i32_77 : i32
    %224 = tpu.assume_multiple %223, 8 : i32
    %225 = arith.index_cast %224 : i32 to index
    %c0_78 = arith.constant 0 : index
    %226 = vector.load %arg7[%225, %c0_78] : memref<64x128xf32, #tpu.memory_space<vmem>>, vector<8x128xf32>
    %cst_79 = arith.constant dense<0.000000e+00> : vector<8x128xf32>
    %227 = tpu.matmul %215, %11, %cst_79 {dimension_numbers = #tpu.dot_dimension_numbers<[1], [0], [0], [1], [0, 0, 1, 1], [], []>} : vector<8x32xf32>, vector<32x128xf32>, vector<8x128xf32> -> vector<8x128xf32>
    %228 = arith.addf %226, %227 : vector<8x128xf32>
    %229 = vector.extract_strided_slice %228 {offsets = [0, 0], sizes = [8, 96], strides = [1, 1]} : vector<8x128xf32> to vector<8x96xf32>
    %230 = arith.negf %229 : vector<8x96xf32>
    %231 = math.exp %230 : vector<8x96xf32>
    %cst_80 = arith.constant 1.000000e+00 : f32
    %232 = vector.broadcast %cst_80 : f32 to vector<8x96xf32>
    %233 = arith.addf %232, %231 : vector<8x96xf32>
    %234 = arith.divf %232, %233 : vector<8x96xf32>
    %235 = vector.extract_strided_slice %228 {offsets = [0, 96], sizes = [8, 32], strides = [1, 1]} : vector<8x128xf32> to vector<8x32xf32>
    %236 = math.tanh %235 : vector<8x32xf32>
    %237 = vector.extract_strided_slice %234 {offsets = [0, 32], sizes = [8, 32], strides = [1, 1]} : vector<8x96xf32> to vector<8x32xf32>
    %238 = arith.mulf %237, %212 : vector<8x32xf32>
    %239 = vector.extract_strided_slice %234 {offsets = [0, 0], sizes = [8, 32], strides = [1, 1]} : vector<8x96xf32> to vector<8x32xf32>
    %240 = arith.mulf %239, %236 : vector<8x32xf32>
    %241 = arith.addf %238, %240 : vector<8x32xf32>
    %242 = vector.extract_strided_slice %234 {offsets = [0, 64], sizes = [8, 32], strides = [1, 1]} : vector<8x96xf32> to vector<8x32xf32>
    %243 = math.tanh %241 : vector<8x32xf32>
    %244 = arith.mulf %242, %243 : vector<8x32xf32>
    %c0_81 = arith.constant 0 : index
    %245 = arith.index_cast %224 : i32 to index
    %c0_82 = arith.constant 0 : index
    %246 = vector.load %arg6[%c0_81, %245, %c0_82] : memref<1x64x32xf32, #tpu.memory_space<vmem>>, vector<1x8x32xf32>
    %247 = vector.shape_cast %246 : vector<1x8x32xf32> to vector<8x32xf32>
    %248 = vector.shape_cast %244 : vector<8x32xf32> to vector<1x8x32xf32>
    tpu.vector_store %arg6[%c0_81, %245, %c0_82], %248 {strides = array<i32>} : memref<1x64x32xf32, #tpu.memory_space<vmem>>, vector<1x8x32xf32>,
    %c8_i32_83 = arith.constant 8 : i32
    %c0_84 = arith.constant 0 : index
    %c0_85 = arith.constant 0 : index
    %249 = vector.load %arg8[%c0_84, %c0_85] : memref<8x32xf32, #tpu.memory_space<vmem>>, vector<8x32xf32>
    tpu.vector_store %arg8[%c0_84, %c0_85], %244 {strides = array<i32>} : memref<8x32xf32, #tpu.memory_space<vmem>>, vector<8x32xf32>,
    %c0_86 = arith.constant 0 : index
    %c0_87 = arith.constant 0 : index
    %250 = vector.load %arg9[%c0_86, %c0_87] : memref<8x32xf32, #tpu.memory_space<vmem>>, vector<8x32xf32>
    tpu.vector_store %arg9[%c0_86, %c0_87], %241 {strides = array<i32>} : memref<8x32xf32, #tpu.memory_space<vmem>>, vector<8x32xf32>,
    return
  }
  func.func @transform_0(%arg0: i32, %arg1: i32) -> (i32, i32, i32) {
    %c1_i32 = arith.constant 1 : i32
    %0 = arith.subi %c1_i32, %arg0 : i32
    %1 = arith.muli %0, %arg1 : i32
    %c0_i32 = arith.constant 0 : i32
    %2 = arith.subi %c0_i32, %arg1 : i32
    %3 = arith.muli %arg0, %2 : i32
    %4 = arith.addi %1, %3 : i32
    %c0_i32_0 = arith.constant 0 : i32
    %c0_i32_1 = arith.constant 0 : i32
    %c0_i32_2 = arith.constant 0 : i32
    return %c0_i32_0, %4, %c0_i32_1 : i32, i32, i32
  }
  func.func @transform_1(%arg0: i32, %arg1: i32) -> (i32, i32, i32, i32) {
    %c0_i32 = arith.constant 0 : i32
    %c0_i32_0 = arith.constant 0 : i32
    %c0_i32_1 = arith.constant 0 : i32
    %c0_i32_2 = arith.constant 0 : i32
    return %arg0, %c0_i32, %c0_i32_0, %c0_i32_1 : i32, i32, i32, i32
  }
  func.func @transform_2(%arg0: i32, %arg1: i32) -> (i32, i32, i32) {
    %c0_i32 = arith.constant 0 : i32
    %c0_i32_0 = arith.constant 0 : i32
    %c0_i32_1 = arith.constant 0 : i32
    return %arg0, %c0_i32, %c0_i32_0 : i32, i32, i32
  }
  func.func @transform_3(%arg0: i32, %arg1: i32) -> (i32, i32, i32) {
    %c0_i32 = arith.constant 0 : i32
    %c0_i32_0 = arith.constant 0 : i32
    %c0_i32_1 = arith.constant 0 : i32
    return %arg0, %c0_i32, %c0_i32_0 : i32, i32, i32
  }
  func.func @transform_4(%arg0: i32, %arg1: i32) -> (i32, i32, i32) {
    %c1_i32 = arith.constant 1 : i32
    %0 = arith.subi %c1_i32, %arg0 : i32
    %1 = arith.muli %0, %arg1 : i32
    %c0_i32 = arith.constant 0 : i32
    %2 = arith.subi %c0_i32, %arg1 : i32
    %3 = arith.muli %arg0, %2 : i32
    %4 = arith.addi %1, %3 : i32
    %c0_i32_0 = arith.constant 0 : i32
    %c0_i32_1 = arith.constant 0 : i32
    return %arg0, %4, %c0_i32_0 : i32, i32, i32
  }
}

module attributes {stable_mosaic.version = 11 : i64} {
  func.func @_bilstm_dir_kernel(%arg0: i32, %arg1: i32, %arg2: memref<2x64x32xf32, #tpu.memory_space<vmem>>, %arg3: memref<1x2x32x128xf32, #tpu.memory_space<vmem>>, %arg4: memref<1x1x128xf32, #tpu.memory_space<vmem>>, %arg5: memref<1x32x128xf32, #tpu.memory_space<vmem>>, %arg6: memref<1x64x32xf32, #tpu.memory_space<vmem>>, %arg7: memref<64x128xf32, #tpu.memory_space<vmem>>, %arg8: memref<8x32xf32, #tpu.memory_space<vmem>>, %arg9: memref<8x32xf32, #tpu.memory_space<vmem>>) attributes {dimension_semantics = [#tpu.dimension_semantics<parallel>, #tpu.dimension_semantics<arbitrary>], iteration_bounds = array<i64: 2, 1>, scalar_prefetch = 0 : i64, scratch_operands = 3 : i64, tpu.core_type = #tpu.core_type<tc>, window_params = [{transform_indices = @transform_0, window_bounds = array<i64: 2, 64, 32>}, {transform_indices = @transform_1, window_bounds = array<i64: 1, 2, 32, 128>}, {transform_indices = @transform_2, window_bounds = array<i64: 1, 1, 128>}, {transform_indices = @transform_3, window_bounds = array<i64: 1, 32, 128>}, {transform_indices = @transform_4, window_bounds = array<i64: 1, 64, 32>}]} {
    %c0 = arith.constant 0 : index
    %c0_0 = arith.constant 0 : index
    %c0_1 = arith.constant 0 : index
    %0 = vector.load %arg2[%c0, %c0_0, %c0_1] : memref<2x64x32xf32, #tpu.memory_space<vmem>>, vector<1x64x32xf32>
    %1 = vector.shape_cast %0 : vector<1x64x32xf32> to vector<64x32xf32>
    %c0_2 = arith.constant 0 : index
    %c0_3 = arith.constant 0 : index
    %c0_4 = arith.constant 0 : index
    %c0_5 = arith.constant 0 : index
    %2 = vector.load %arg3[%c0_2, %c0_3, %c0_4, %c0_5] : memref<1x2x32x128xf32, #tpu.memory_space<vmem>>, vector<1x1x32x128xf32>
    %3 = vector.shape_cast %2 : vector<1x1x32x128xf32> to vector<32x128xf32>
    %cst = arith.constant dense<0.000000e+00> : vector<64x128xf32>
    %4 = tpu.matmul %1, %3, %cst {dimension_numbers = #tpu.dot_dimension_numbers<[1], [0], [0], [1], [0, 0, 1, 1], [], []>} : vector<64x32xf32>, vector<32x128xf32>, vector<64x128xf32> -> vector<64x128xf32>
    %c1 = arith.constant 1 : index
    %c0_6 = arith.constant 0 : index
    %c0_7 = arith.constant 0 : index
    %5 = vector.load %arg2[%c1, %c0_6, %c0_7] : memref<2x64x32xf32, #tpu.memory_space<vmem>>, vector<1x64x32xf32>
    %6 = vector.shape_cast %5 : vector<1x64x32xf32> to vector<64x32xf32>
    %c0_8 = arith.constant 0 : index
    %c1_9 = arith.constant 1 : index
    %c0_10 = arith.constant 0 : index
    %c0_11 = arith.constant 0 : index
    %7 = vector.load %arg3[%c0_8, %c1_9, %c0_10, %c0_11] : memref<1x2x32x128xf32, #tpu.memory_space<vmem>>, vector<1x1x32x128xf32>
    %8 = vector.shape_cast %7 : vector<1x1x32x128xf32> to vector<32x128xf32>
    %cst_12 = arith.constant dense<0.000000e+00> : vector<64x128xf32>
    %9 = tpu.matmul %6, %8, %cst_12 {dimension_numbers = #tpu.dot_dimension_numbers<[1], [0], [0], [1], [0, 0, 1, 1], [], []>} : vector<64x32xf32>, vector<32x128xf32>, vector<64x128xf32> -> vector<64x128xf32>
    %10 = arith.addf %4, %9 : vector<64x128xf32>
    %c0_13 = arith.constant 0 : index
    %c0_14 = arith.constant 0 : index
    %c0_15 = arith.constant 0 : index
    %11 = vector.load %arg4[%c0_13, %c0_14, %c0_15] : memref<1x1x128xf32, #tpu.memory_space<vmem>>, vector<1x1x128xf32>
    %12 = vector.shape_cast %11 : vector<1x1x128xf32> to vector<1x128xf32>
    %13 = vector.broadcast %12 : vector<1x128xf32> to vector<64x128xf32>
    %14 = arith.addf %10, %13 : vector<64x128xf32>
    %c0_16 = arith.constant 0 : index
    %c0_17 = arith.constant 0 : index
    %15 = vector.load %arg7[%c0_16, %c0_17] : memref<64x128xf32, #tpu.memory_space<vmem>>, vector<64x128xf32>
    tpu.vector_store %arg7[%c0_16, %c0_17], %14 {strides = array<i32>} : memref<64x128xf32, #tpu.memory_space<vmem>>, vector<64x128xf32>,
    %c0_18 = arith.constant 0 : index
    %c0_19 = arith.constant 0 : index
    %c0_20 = arith.constant 0 : index
    %16 = vector.load %arg5[%c0_18, %c0_19, %c0_20] : memref<1x32x128xf32, #tpu.memory_space<vmem>>, vector<1x32x128xf32>
    %17 = vector.shape_cast %16 : vector<1x32x128xf32> to vector<32x128xf32>
    %c0_i32 = arith.constant 0 : i32
    %18 = arith.cmpi eq, %arg1, %c0_i32 : i32
    %19 = arith.extui %18 : i1 to i32
    %c0_i32_21 = arith.constant 0 : i32
    %20 = arith.cmpi ne, %19, %c0_i32_21 : i32
    scf.if %20 {
      %cst_95 = arith.constant 0.000000e+00 : f32
      %257 = vector.broadcast %cst_95 : f32 to vector<8x32xf32>
      %c0_96 = arith.constant 0 : index
      %c0_97 = arith.constant 0 : index
      %258 = vector.load %arg8[%c0_96, %c0_97] : memref<8x32xf32, #tpu.memory_space<vmem>>, vector<8x32xf32>
      tpu.vector_store %arg8[%c0_96, %c0_97], %257 {strides = array<i32>} : memref<8x32xf32, #tpu.memory_space<vmem>>, vector<8x32xf32>,
      %cst_98 = arith.constant 0.000000e+00 : f32
      %259 = vector.broadcast %cst_98 : f32 to vector<8x32xf32>
      %c0_99 = arith.constant 0 : index
      %c0_100 = arith.constant 0 : index
      %260 = vector.load %arg9[%c0_99, %c0_100] : memref<8x32xf32, #tpu.memory_space<vmem>>, vector<8x32xf32>
      tpu.vector_store %arg9[%c0_99, %c0_100], %259 {strides = array<i32>} : memref<8x32xf32, #tpu.memory_space<vmem>>, vector<8x32xf32>,
    } else {
    }
    %c0_22 = arith.constant 0 : index
    %c0_23 = arith.constant 0 : index
    %21 = vector.load %arg8[%c0_22, %c0_23] : memref<8x32xf32, #tpu.memory_space<vmem>>, vector<8x32xf32>
    %c0_24 = arith.constant 0 : index
    %c0_25 = arith.constant 0 : index
    %22 = vector.load %arg9[%c0_24, %c0_25] : memref<8x32xf32, #tpu.memory_space<vmem>>, vector<8x32xf32>
    %c0_i32_26 = arith.constant 0 : i32
    %c0_i32_27 = arith.constant 0 : i32
    %23 = arith.cmpi eq, %arg0, %c0_i32_27 : i32
    %c7_i32 = arith.constant 7 : i32
    %24 = arith.subi %c7_i32, %c0_i32_26 : i32
    %25 = arith.select %23, %c0_i32_26, %24 : i32
    %c8_i32 = arith.constant 8 : i32
    %26 = arith.muli %25, %c8_i32 : i32
    %27 = tpu.assume_multiple %26, 8 : i32
    %28 = arith.index_cast %27 : i32 to index
    %c0_28 = arith.constant 0 : index
    %29 = vector.load %arg7[%28, %c0_28] : memref<64x128xf32, #tpu.memory_space<vmem>>, vector<8x128xf32>
    %cst_29 = arith.constant dense<0.000000e+00> : vector<8x128xf32>
    %30 = tpu.matmul %21, %17, %cst_29 {dimension_numbers = #tpu.dot_dimension_numbers<[1], [0], [0], [1], [0, 0, 1, 1], [], []>} : vector<8x32xf32>, vector<32x128xf32>, vector<8x128xf32> -> vector<8x128xf32>
    %31 = arith.addf %29, %30 : vector<8x128xf32>
    %32 = vector.extract_strided_slice %31 {offsets = [0, 0], sizes = [8, 96], strides = [1, 1]} : vector<8x128xf32> to vector<8x96xf32>
    %33 = arith.negf %32 : vector<8x96xf32>
    %34 = math.exp %33 : vector<8x96xf32>
    %cst_30 = arith.constant 1.000000e+00 : f32
    %35 = vector.broadcast %cst_30 : f32 to vector<8x96xf32>
    %36 = arith.addf %35, %34 : vector<8x96xf32>
    %37 = arith.divf %35, %36 : vector<8x96xf32>
    %38 = vector.extract_strided_slice %31 {offsets = [0, 96], sizes = [8, 32], strides = [1, 1]} : vector<8x128xf32> to vector<8x32xf32>
    %39 = math.tanh %38 : vector<8x32xf32>
    %40 = vector.extract_strided_slice %37 {offsets = [0, 32], sizes = [8, 32], strides = [1, 1]} : vector<8x96xf32> to vector<8x32xf32>
    %41 = arith.mulf %40, %22 : vector<8x32xf32>
    %42 = vector.extract_strided_slice %37 {offsets = [0, 0], sizes = [8, 32], strides = [1, 1]} : vector<8x96xf32> to vector<8x32xf32>
    %43 = arith.mulf %42, %39 : vector<8x32xf32>
    %44 = arith.addf %41, %43 : vector<8x32xf32>
    %45 = vector.extract_strided_slice %37 {offsets = [0, 64], sizes = [8, 32], strides = [1, 1]} : vector<8x96xf32> to vector<8x32xf32>
    %46 = math.tanh %44 : vector<8x32xf32>
    %47 = arith.mulf %45, %46 : vector<8x32xf32>
    %c0_31 = arith.constant 0 : index
    %48 = arith.index_cast %27 : i32 to index
    %c0_32 = arith.constant 0 : index
    %49 = vector.load %arg6[%c0_31, %48, %c0_32] : memref<1x64x32xf32, #tpu.memory_space<vmem>>, vector<1x8x32xf32>
    %50 = vector.shape_cast %49 : vector<1x8x32xf32> to vector<8x32xf32>
    %51 = vector.shape_cast %47 : vector<8x32xf32> to vector<1x8x32xf32>
    tpu.vector_store %arg6[%c0_31, %48, %c0_32], %51 {strides = array<i32>} : memref<1x64x32xf32, #tpu.memory_space<vmem>>, vector<1x8x32xf32>,
    %c1_i32 = arith.constant 1 : i32
    %c0_i32_33 = arith.constant 0 : i32
    %52 = arith.cmpi eq, %arg0, %c0_i32_33 : i32
    %c7_i32_34 = arith.constant 7 : i32
    %53 = arith.subi %c7_i32_34, %c1_i32 : i32
    %54 = arith.select %52, %c1_i32, %53 : i32
    %c8_i32_35 = arith.constant 8 : i32
    %55 = arith.muli %54, %c8_i32_35 : i32
    %56 = tpu.assume_multiple %55, 8 : i32
    %57 = arith.index_cast %56 : i32 to index
    %c0_36 = arith.constant 0 : index
    %58 = vector.load %arg7[%57, %c0_36] : memref<64x128xf32, #tpu.memory_space<vmem>>, vector<8x128xf32>
    %cst_37 = arith.constant dense<0.000000e+00> : vector<8x128xf32>
    %59 = tpu.matmul %47, %17, %cst_37 {dimension_numbers = #tpu.dot_dimension_numbers<[1], [0], [0], [1], [0, 0, 1, 1], [], []>} : vector<8x32xf32>, vector<32x128xf32>, vector<8x128xf32> -> vector<8x128xf32>
    %60 = arith.addf %58, %59 : vector<8x128xf32>
    %61 = vector.extract_strided_slice %60 {offsets = [0, 0], sizes = [8, 96], strides = [1, 1]} : vector<8x128xf32> to vector<8x96xf32>
    %62 = arith.negf %61 : vector<8x96xf32>
    %63 = math.exp %62 : vector<8x96xf32>
    %cst_38 = arith.constant 1.000000e+00 : f32
    %64 = vector.broadcast %cst_38 : f32 to vector<8x96xf32>
    %65 = arith.addf %64, %63 : vector<8x96xf32>
    %66 = arith.divf %64, %65 : vector<8x96xf32>
    %67 = vector.extract_strided_slice %60 {offsets = [0, 96], sizes = [8, 32], strides = [1, 1]} : vector<8x128xf32> to vector<8x32xf32>
    %68 = math.tanh %67 : vector<8x32xf32>
    %69 = vector.extract_strided_slice %66 {offsets = [0, 32], sizes = [8, 32], strides = [1, 1]} : vector<8x96xf32> to vector<8x32xf32>
    %70 = arith.mulf %69, %44 : vector<8x32xf32>
    %71 = vector.extract_strided_slice %66 {offsets = [0, 0], sizes = [8, 32], strides = [1, 1]} : vector<8x96xf32> to vector<8x32xf32>
    %72 = arith.mulf %71, %68 : vector<8x32xf32>
    %73 = arith.addf %70, %72 : vector<8x32xf32>
    %74 = vector.extract_strided_slice %66 {offsets = [0, 64], sizes = [8, 32], strides = [1, 1]} : vector<8x96xf32> to vector<8x32xf32>
    %75 = math.tanh %73 : vector<8x32xf32>
    %76 = arith.mulf %74, %75 : vector<8x32xf32>
    %c0_39 = arith.constant 0 : index
    %77 = arith.index_cast %56 : i32 to index
    %c0_40 = arith.constant 0 : index
    %78 = vector.load %arg6[%c0_39, %77, %c0_40] : memref<1x64x32xf32, #tpu.memory_space<vmem>>, vector<1x8x32xf32>
    %79 = vector.shape_cast %78 : vector<1x8x32xf32> to vector<8x32xf32>
    %80 = vector.shape_cast %76 : vector<8x32xf32> to vector<1x8x32xf32>
    tpu.vector_store %arg6[%c0_39, %77, %c0_40], %80 {strides = array<i32>} : memref<1x64x32xf32, #tpu.memory_space<vmem>>, vector<1x8x32xf32>,
    %c2_i32 = arith.constant 2 : i32
    %c0_i32_41 = arith.constant 0 : i32
    %81 = arith.cmpi eq, %arg0, %c0_i32_41 : i32
    %c7_i32_42 = arith.constant 7 : i32
    %82 = arith.subi %c7_i32_42, %c2_i32 : i32
    %83 = arith.select %81, %c2_i32, %82 : i32
    %c8_i32_43 = arith.constant 8 : i32
    %84 = arith.muli %83, %c8_i32_43 : i32
    %85 = tpu.assume_multiple %84, 8 : i32
    %86 = arith.index_cast %85 : i32 to index
    %c0_44 = arith.constant 0 : index
    %87 = vector.load %arg7[%86, %c0_44] : memref<64x128xf32, #tpu.memory_space<vmem>>, vector<8x128xf32>
    %cst_45 = arith.constant dense<0.000000e+00> : vector<8x128xf32>
    %88 = tpu.matmul %76, %17, %cst_45 {dimension_numbers = #tpu.dot_dimension_numbers<[1], [0], [0], [1], [0, 0, 1, 1], [], []>} : vector<8x32xf32>, vector<32x128xf32>, vector<8x128xf32> -> vector<8x128xf32>
    %89 = arith.addf %87, %88 : vector<8x128xf32>
    %90 = vector.extract_strided_slice %89 {offsets = [0, 0], sizes = [8, 96], strides = [1, 1]} : vector<8x128xf32> to vector<8x96xf32>
    %91 = arith.negf %90 : vector<8x96xf32>
    %92 = math.exp %91 : vector<8x96xf32>
    %cst_46 = arith.constant 1.000000e+00 : f32
    %93 = vector.broadcast %cst_46 : f32 to vector<8x96xf32>
    %94 = arith.addf %93, %92 : vector<8x96xf32>
    %95 = arith.divf %93, %94 : vector<8x96xf32>
    %96 = vector.extract_strided_slice %89 {offsets = [0, 96], sizes = [8, 32], strides = [1, 1]} : vector<8x128xf32> to vector<8x32xf32>
    %97 = math.tanh %96 : vector<8x32xf32>
    %98 = vector.extract_strided_slice %95 {offsets = [0, 32], sizes = [8, 32], strides = [1, 1]} : vector<8x96xf32> to vector<8x32xf32>
    %99 = arith.mulf %98, %73 : vector<8x32xf32>
    %100 = vector.extract_strided_slice %95 {offsets = [0, 0], sizes = [8, 32], strides = [1, 1]} : vector<8x96xf32> to vector<8x32xf32>
    %101 = arith.mulf %100, %97 : vector<8x32xf32>
    %102 = arith.addf %99, %101 : vector<8x32xf32>
    %103 = vector.extract_strided_slice %95 {offsets = [0, 64], sizes = [8, 32], strides = [1, 1]} : vector<8x96xf32> to vector<8x32xf32>
    %104 = math.tanh %102 : vector<8x32xf32>
    %105 = arith.mulf %103, %104 : vector<8x32xf32>
    %c0_47 = arith.constant 0 : index
    %106 = arith.index_cast %85 : i32 to index
    %c0_48 = arith.constant 0 : index
    %107 = vector.load %arg6[%c0_47, %106, %c0_48] : memref<1x64x32xf32, #tpu.memory_space<vmem>>, vector<1x8x32xf32>
    %108 = vector.shape_cast %107 : vector<1x8x32xf32> to vector<8x32xf32>
    %109 = vector.shape_cast %105 : vector<8x32xf32> to vector<1x8x32xf32>
    tpu.vector_store %arg6[%c0_47, %106, %c0_48], %109 {strides = array<i32>} : memref<1x64x32xf32, #tpu.memory_space<vmem>>, vector<1x8x32xf32>,
    %c3_i32 = arith.constant 3 : i32
    %c0_i32_49 = arith.constant 0 : i32
    %110 = arith.cmpi eq, %arg0, %c0_i32_49 : i32
    %c7_i32_50 = arith.constant 7 : i32
    %111 = arith.subi %c7_i32_50, %c3_i32 : i32
    %112 = arith.select %110, %c3_i32, %111 : i32
    %c8_i32_51 = arith.constant 8 : i32
    %113 = arith.muli %112, %c8_i32_51 : i32
    %114 = tpu.assume_multiple %113, 8 : i32
    %115 = arith.index_cast %114 : i32 to index
    %c0_52 = arith.constant 0 : index
    %116 = vector.load %arg7[%115, %c0_52] : memref<64x128xf32, #tpu.memory_space<vmem>>, vector<8x128xf32>
    %cst_53 = arith.constant dense<0.000000e+00> : vector<8x128xf32>
    %117 = tpu.matmul %105, %17, %cst_53 {dimension_numbers = #tpu.dot_dimension_numbers<[1], [0], [0], [1], [0, 0, 1, 1], [], []>} : vector<8x32xf32>, vector<32x128xf32>, vector<8x128xf32> -> vector<8x128xf32>
    %118 = arith.addf %116, %117 : vector<8x128xf32>
    %119 = vector.extract_strided_slice %118 {offsets = [0, 0], sizes = [8, 96], strides = [1, 1]} : vector<8x128xf32> to vector<8x96xf32>
    %120 = arith.negf %119 : vector<8x96xf32>
    %121 = math.exp %120 : vector<8x96xf32>
    %cst_54 = arith.constant 1.000000e+00 : f32
    %122 = vector.broadcast %cst_54 : f32 to vector<8x96xf32>
    %123 = arith.addf %122, %121 : vector<8x96xf32>
    %124 = arith.divf %122, %123 : vector<8x96xf32>
    %125 = vector.extract_strided_slice %118 {offsets = [0, 96], sizes = [8, 32], strides = [1, 1]} : vector<8x128xf32> to vector<8x32xf32>
    %126 = math.tanh %125 : vector<8x32xf32>
    %127 = vector.extract_strided_slice %124 {offsets = [0, 32], sizes = [8, 32], strides = [1, 1]} : vector<8x96xf32> to vector<8x32xf32>
    %128 = arith.mulf %127, %102 : vector<8x32xf32>
    %129 = vector.extract_strided_slice %124 {offsets = [0, 0], sizes = [8, 32], strides = [1, 1]} : vector<8x96xf32> to vector<8x32xf32>
    %130 = arith.mulf %129, %126 : vector<8x32xf32>
    %131 = arith.addf %128, %130 : vector<8x32xf32>
    %132 = vector.extract_strided_slice %124 {offsets = [0, 64], sizes = [8, 32], strides = [1, 1]} : vector<8x96xf32> to vector<8x32xf32>
    %133 = math.tanh %131 : vector<8x32xf32>
    %134 = arith.mulf %132, %133 : vector<8x32xf32>
    %c0_55 = arith.constant 0 : index
    %135 = arith.index_cast %114 : i32 to index
    %c0_56 = arith.constant 0 : index
    %136 = vector.load %arg6[%c0_55, %135, %c0_56] : memref<1x64x32xf32, #tpu.memory_space<vmem>>, vector<1x8x32xf32>
    %137 = vector.shape_cast %136 : vector<1x8x32xf32> to vector<8x32xf32>
    %138 = vector.shape_cast %134 : vector<8x32xf32> to vector<1x8x32xf32>
    tpu.vector_store %arg6[%c0_55, %135, %c0_56], %138 {strides = array<i32>} : memref<1x64x32xf32, #tpu.memory_space<vmem>>, vector<1x8x32xf32>,
    %c4_i32 = arith.constant 4 : i32
    %c0_i32_57 = arith.constant 0 : i32
    %139 = arith.cmpi eq, %arg0, %c0_i32_57 : i32
    %c7_i32_58 = arith.constant 7 : i32
    %140 = arith.subi %c7_i32_58, %c4_i32 : i32
    %141 = arith.select %139, %c4_i32, %140 : i32
    %c8_i32_59 = arith.constant 8 : i32
    %142 = arith.muli %141, %c8_i32_59 : i32
    %143 = tpu.assume_multiple %142, 8 : i32
    %144 = arith.index_cast %143 : i32 to index
    %c0_60 = arith.constant 0 : index
    %145 = vector.load %arg7[%144, %c0_60] : memref<64x128xf32, #tpu.memory_space<vmem>>, vector<8x128xf32>
    %cst_61 = arith.constant dense<0.000000e+00> : vector<8x128xf32>
    %146 = tpu.matmul %134, %17, %cst_61 {dimension_numbers = #tpu.dot_dimension_numbers<[1], [0], [0], [1], [0, 0, 1, 1], [], []>} : vector<8x32xf32>, vector<32x128xf32>, vector<8x128xf32> -> vector<8x128xf32>
    %147 = arith.addf %145, %146 : vector<8x128xf32>
    %148 = vector.extract_strided_slice %147 {offsets = [0, 0], sizes = [8, 96], strides = [1, 1]} : vector<8x128xf32> to vector<8x96xf32>
    %149 = arith.negf %148 : vector<8x96xf32>
    %150 = math.exp %149 : vector<8x96xf32>
    %cst_62 = arith.constant 1.000000e+00 : f32
    %151 = vector.broadcast %cst_62 : f32 to vector<8x96xf32>
    %152 = arith.addf %151, %150 : vector<8x96xf32>
    %153 = arith.divf %151, %152 : vector<8x96xf32>
    %154 = vector.extract_strided_slice %147 {offsets = [0, 96], sizes = [8, 32], strides = [1, 1]} : vector<8x128xf32> to vector<8x32xf32>
    %155 = math.tanh %154 : vector<8x32xf32>
    %156 = vector.extract_strided_slice %153 {offsets = [0, 32], sizes = [8, 32], strides = [1, 1]} : vector<8x96xf32> to vector<8x32xf32>
    %157 = arith.mulf %156, %131 : vector<8x32xf32>
    %158 = vector.extract_strided_slice %153 {offsets = [0, 0], sizes = [8, 32], strides = [1, 1]} : vector<8x96xf32> to vector<8x32xf32>
    %159 = arith.mulf %158, %155 : vector<8x32xf32>
    %160 = arith.addf %157, %159 : vector<8x32xf32>
    %161 = vector.extract_strided_slice %153 {offsets = [0, 64], sizes = [8, 32], strides = [1, 1]} : vector<8x96xf32> to vector<8x32xf32>
    %162 = math.tanh %160 : vector<8x32xf32>
    %163 = arith.mulf %161, %162 : vector<8x32xf32>
    %c0_63 = arith.constant 0 : index
    %164 = arith.index_cast %143 : i32 to index
    %c0_64 = arith.constant 0 : index
    %165 = vector.load %arg6[%c0_63, %164, %c0_64] : memref<1x64x32xf32, #tpu.memory_space<vmem>>, vector<1x8x32xf32>
    %166 = vector.shape_cast %165 : vector<1x8x32xf32> to vector<8x32xf32>
    %167 = vector.shape_cast %163 : vector<8x32xf32> to vector<1x8x32xf32>
    tpu.vector_store %arg6[%c0_63, %164, %c0_64], %167 {strides = array<i32>} : memref<1x64x32xf32, #tpu.memory_space<vmem>>, vector<1x8x32xf32>,
    %c5_i32 = arith.constant 5 : i32
    %c0_i32_65 = arith.constant 0 : i32
    %168 = arith.cmpi eq, %arg0, %c0_i32_65 : i32
    %c7_i32_66 = arith.constant 7 : i32
    %169 = arith.subi %c7_i32_66, %c5_i32 : i32
    %170 = arith.select %168, %c5_i32, %169 : i32
    %c8_i32_67 = arith.constant 8 : i32
    %171 = arith.muli %170, %c8_i32_67 : i32
    %172 = tpu.assume_multiple %171, 8 : i32
    %173 = arith.index_cast %172 : i32 to index
    %c0_68 = arith.constant 0 : index
    %174 = vector.load %arg7[%173, %c0_68] : memref<64x128xf32, #tpu.memory_space<vmem>>, vector<8x128xf32>
    %cst_69 = arith.constant dense<0.000000e+00> : vector<8x128xf32>
    %175 = tpu.matmul %163, %17, %cst_69 {dimension_numbers = #tpu.dot_dimension_numbers<[1], [0], [0], [1], [0, 0, 1, 1], [], []>} : vector<8x32xf32>, vector<32x128xf32>, vector<8x128xf32> -> vector<8x128xf32>
    %176 = arith.addf %174, %175 : vector<8x128xf32>
    %177 = vector.extract_strided_slice %176 {offsets = [0, 0], sizes = [8, 96], strides = [1, 1]} : vector<8x128xf32> to vector<8x96xf32>
    %178 = arith.negf %177 : vector<8x96xf32>
    %179 = math.exp %178 : vector<8x96xf32>
    %cst_70 = arith.constant 1.000000e+00 : f32
    %180 = vector.broadcast %cst_70 : f32 to vector<8x96xf32>
    %181 = arith.addf %180, %179 : vector<8x96xf32>
    %182 = arith.divf %180, %181 : vector<8x96xf32>
    %183 = vector.extract_strided_slice %176 {offsets = [0, 96], sizes = [8, 32], strides = [1, 1]} : vector<8x128xf32> to vector<8x32xf32>
    %184 = math.tanh %183 : vector<8x32xf32>
    %185 = vector.extract_strided_slice %182 {offsets = [0, 32], sizes = [8, 32], strides = [1, 1]} : vector<8x96xf32> to vector<8x32xf32>
    %186 = arith.mulf %185, %160 : vector<8x32xf32>
    %187 = vector.extract_strided_slice %182 {offsets = [0, 0], sizes = [8, 32], strides = [1, 1]} : vector<8x96xf32> to vector<8x32xf32>
    %188 = arith.mulf %187, %184 : vector<8x32xf32>
    %189 = arith.addf %186, %188 : vector<8x32xf32>
    %190 = vector.extract_strided_slice %182 {offsets = [0, 64], sizes = [8, 32], strides = [1, 1]} : vector<8x96xf32> to vector<8x32xf32>
    %191 = math.tanh %189 : vector<8x32xf32>
    %192 = arith.mulf %190, %191 : vector<8x32xf32>
    %c0_71 = arith.constant 0 : index
    %193 = arith.index_cast %172 : i32 to index
    %c0_72 = arith.constant 0 : index
    %194 = vector.load %arg6[%c0_71, %193, %c0_72] : memref<1x64x32xf32, #tpu.memory_space<vmem>>, vector<1x8x32xf32>
    %195 = vector.shape_cast %194 : vector<1x8x32xf32> to vector<8x32xf32>
    %196 = vector.shape_cast %192 : vector<8x32xf32> to vector<1x8x32xf32>
    tpu.vector_store %arg6[%c0_71, %193, %c0_72], %196 {strides = array<i32>} : memref<1x64x32xf32, #tpu.memory_space<vmem>>, vector<1x8x32xf32>,
    %c6_i32 = arith.constant 6 : i32
    %c0_i32_73 = arith.constant 0 : i32
    %197 = arith.cmpi eq, %arg0, %c0_i32_73 : i32
    %c7_i32_74 = arith.constant 7 : i32
    %198 = arith.subi %c7_i32_74, %c6_i32 : i32
    %199 = arith.select %197, %c6_i32, %198 : i32
    %c8_i32_75 = arith.constant 8 : i32
    %200 = arith.muli %199, %c8_i32_75 : i32
    %201 = tpu.assume_multiple %200, 8 : i32
    %202 = arith.index_cast %201 : i32 to index
    %c0_76 = arith.constant 0 : index
    %203 = vector.load %arg7[%202, %c0_76] : memref<64x128xf32, #tpu.memory_space<vmem>>, vector<8x128xf32>
    %cst_77 = arith.constant dense<0.000000e+00> : vector<8x128xf32>
    %204 = tpu.matmul %192, %17, %cst_77 {dimension_numbers = #tpu.dot_dimension_numbers<[1], [0], [0], [1], [0, 0, 1, 1], [], []>} : vector<8x32xf32>, vector<32x128xf32>, vector<8x128xf32> -> vector<8x128xf32>
    %205 = arith.addf %203, %204 : vector<8x128xf32>
    %206 = vector.extract_strided_slice %205 {offsets = [0, 0], sizes = [8, 96], strides = [1, 1]} : vector<8x128xf32> to vector<8x96xf32>
    %207 = arith.negf %206 : vector<8x96xf32>
    %208 = math.exp %207 : vector<8x96xf32>
    %cst_78 = arith.constant 1.000000e+00 : f32
    %209 = vector.broadcast %cst_78 : f32 to vector<8x96xf32>
    %210 = arith.addf %209, %208 : vector<8x96xf32>
    %211 = arith.divf %209, %210 : vector<8x96xf32>
    %212 = vector.extract_strided_slice %205 {offsets = [0, 96], sizes = [8, 32], strides = [1, 1]} : vector<8x128xf32> to vector<8x32xf32>
    %213 = math.tanh %212 : vector<8x32xf32>
    %214 = vector.extract_strided_slice %211 {offsets = [0, 32], sizes = [8, 32], strides = [1, 1]} : vector<8x96xf32> to vector<8x32xf32>
    %215 = arith.mulf %214, %189 : vector<8x32xf32>
    %216 = vector.extract_strided_slice %211 {offsets = [0, 0], sizes = [8, 32], strides = [1, 1]} : vector<8x96xf32> to vector<8x32xf32>
    %217 = arith.mulf %216, %213 : vector<8x32xf32>
    %218 = arith.addf %215, %217 : vector<8x32xf32>
    %219 = vector.extract_strided_slice %211 {offsets = [0, 64], sizes = [8, 32], strides = [1, 1]} : vector<8x96xf32> to vector<8x32xf32>
    %220 = math.tanh %218 : vector<8x32xf32>
    %221 = arith.mulf %219, %220 : vector<8x32xf32>
    %c0_79 = arith.constant 0 : index
    %222 = arith.index_cast %201 : i32 to index
    %c0_80 = arith.constant 0 : index
    %223 = vector.load %arg6[%c0_79, %222, %c0_80] : memref<1x64x32xf32, #tpu.memory_space<vmem>>, vector<1x8x32xf32>
    %224 = vector.shape_cast %223 : vector<1x8x32xf32> to vector<8x32xf32>
    %225 = vector.shape_cast %221 : vector<8x32xf32> to vector<1x8x32xf32>
    tpu.vector_store %arg6[%c0_79, %222, %c0_80], %225 {strides = array<i32>} : memref<1x64x32xf32, #tpu.memory_space<vmem>>, vector<1x8x32xf32>,
    %c7_i32_81 = arith.constant 7 : i32
    %c0_i32_82 = arith.constant 0 : i32
    %226 = arith.cmpi eq, %arg0, %c0_i32_82 : i32
    %c7_i32_83 = arith.constant 7 : i32
    %227 = arith.subi %c7_i32_83, %c7_i32_81 : i32
    %228 = arith.select %226, %c7_i32_81, %227 : i32
    %c8_i32_84 = arith.constant 8 : i32
    %229 = arith.muli %228, %c8_i32_84 : i32
    %230 = tpu.assume_multiple %229, 8 : i32
    %231 = arith.index_cast %230 : i32 to index
    %c0_85 = arith.constant 0 : index
    %232 = vector.load %arg7[%231, %c0_85] : memref<64x128xf32, #tpu.memory_space<vmem>>, vector<8x128xf32>
    %cst_86 = arith.constant dense<0.000000e+00> : vector<8x128xf32>
    %233 = tpu.matmul %221, %17, %cst_86 {dimension_numbers = #tpu.dot_dimension_numbers<[1], [0], [0], [1], [0, 0, 1, 1], [], []>} : vector<8x32xf32>, vector<32x128xf32>, vector<8x128xf32> -> vector<8x128xf32>
    %234 = arith.addf %232, %233 : vector<8x128xf32>
    %235 = vector.extract_strided_slice %234 {offsets = [0, 0], sizes = [8, 96], strides = [1, 1]} : vector<8x128xf32> to vector<8x96xf32>
    %236 = arith.negf %235 : vector<8x96xf32>
    %237 = math.exp %236 : vector<8x96xf32>
    %cst_87 = arith.constant 1.000000e+00 : f32
    %238 = vector.broadcast %cst_87 : f32 to vector<8x96xf32>
    %239 = arith.addf %238, %237 : vector<8x96xf32>
    %240 = arith.divf %238, %239 : vector<8x96xf32>
    %241 = vector.extract_strided_slice %234 {offsets = [0, 96], sizes = [8, 32], strides = [1, 1]} : vector<8x128xf32> to vector<8x32xf32>
    %242 = math.tanh %241 : vector<8x32xf32>
    %243 = vector.extract_strided_slice %240 {offsets = [0, 32], sizes = [8, 32], strides = [1, 1]} : vector<8x96xf32> to vector<8x32xf32>
    %244 = arith.mulf %243, %218 : vector<8x32xf32>
    %245 = vector.extract_strided_slice %240 {offsets = [0, 0], sizes = [8, 32], strides = [1, 1]} : vector<8x96xf32> to vector<8x32xf32>
    %246 = arith.mulf %245, %242 : vector<8x32xf32>
    %247 = arith.addf %244, %246 : vector<8x32xf32>
    %248 = vector.extract_strided_slice %240 {offsets = [0, 64], sizes = [8, 32], strides = [1, 1]} : vector<8x96xf32> to vector<8x32xf32>
    %249 = math.tanh %247 : vector<8x32xf32>
    %250 = arith.mulf %248, %249 : vector<8x32xf32>
    %c0_88 = arith.constant 0 : index
    %251 = arith.index_cast %230 : i32 to index
    %c0_89 = arith.constant 0 : index
    %252 = vector.load %arg6[%c0_88, %251, %c0_89] : memref<1x64x32xf32, #tpu.memory_space<vmem>>, vector<1x8x32xf32>
    %253 = vector.shape_cast %252 : vector<1x8x32xf32> to vector<8x32xf32>
    %254 = vector.shape_cast %250 : vector<8x32xf32> to vector<1x8x32xf32>
    tpu.vector_store %arg6[%c0_88, %251, %c0_89], %254 {strides = array<i32>} : memref<1x64x32xf32, #tpu.memory_space<vmem>>, vector<1x8x32xf32>,
    %c8_i32_90 = arith.constant 8 : i32
    %c0_91 = arith.constant 0 : index
    %c0_92 = arith.constant 0 : index
    %255 = vector.load %arg8[%c0_91, %c0_92] : memref<8x32xf32, #tpu.memory_space<vmem>>, vector<8x32xf32>
    tpu.vector_store %arg8[%c0_91, %c0_92], %250 {strides = array<i32>} : memref<8x32xf32, #tpu.memory_space<vmem>>, vector<8x32xf32>,
    %c0_93 = arith.constant 0 : index
    %c0_94 = arith.constant 0 : index
    %256 = vector.load %arg9[%c0_93, %c0_94] : memref<8x32xf32, #tpu.memory_space<vmem>>, vector<8x32xf32>
    tpu.vector_store %arg9[%c0_93, %c0_94], %247 {strides = array<i32>} : memref<8x32xf32, #tpu.memory_space<vmem>>, vector<8x32xf32>,
    return
  }
  func.func @transform_0(%arg0: i32, %arg1: i32) -> (i32, i32, i32) {
    %c1_i32 = arith.constant 1 : i32
    %0 = arith.subi %c1_i32, %arg0 : i32
    %1 = arith.muli %0, %arg1 : i32
    %c0_i32 = arith.constant 0 : i32
    %2 = arith.subi %c0_i32, %arg1 : i32
    %3 = arith.muli %arg0, %2 : i32
    %4 = arith.addi %1, %3 : i32
    %c0_i32_0 = arith.constant 0 : i32
    %c0_i32_1 = arith.constant 0 : i32
    %c0_i32_2 = arith.constant 0 : i32
    return %c0_i32_0, %4, %c0_i32_1 : i32, i32, i32
  }
  func.func @transform_1(%arg0: i32, %arg1: i32) -> (i32, i32, i32, i32) {
    %c0_i32 = arith.constant 0 : i32
    %c0_i32_0 = arith.constant 0 : i32
    %c0_i32_1 = arith.constant 0 : i32
    %c0_i32_2 = arith.constant 0 : i32
    return %arg0, %c0_i32, %c0_i32_0, %c0_i32_1 : i32, i32, i32, i32
  }
  func.func @transform_2(%arg0: i32, %arg1: i32) -> (i32, i32, i32) {
    %c0_i32 = arith.constant 0 : i32
    %c0_i32_0 = arith.constant 0 : i32
    %c0_i32_1 = arith.constant 0 : i32
    return %arg0, %c0_i32, %c0_i32_0 : i32, i32, i32
  }
  func.func @transform_3(%arg0: i32, %arg1: i32) -> (i32, i32, i32) {
    %c0_i32 = arith.constant 0 : i32
    %c0_i32_0 = arith.constant 0 : i32
    %c0_i32_1 = arith.constant 0 : i32
    return %arg0, %c0_i32, %c0_i32_0 : i32, i32, i32
  }
  func.func @transform_4(%arg0: i32, %arg1: i32) -> (i32, i32, i32) {
    %c1_i32 = arith.constant 1 : i32
    %0 = arith.subi %c1_i32, %arg0 : i32
    %1 = arith.muli %0, %arg1 : i32
    %c0_i32 = arith.constant 0 : i32
    %2 = arith.subi %c0_i32, %arg1 : i32
    %3 = arith.muli %arg0, %2 : i32
    %4 = arith.addi %1, %3 : i32
    %c0_i32_0 = arith.constant 0 : i32
    %c0_i32_1 = arith.constant 0 : i32
    return %arg0, %4, %c0_i32_0 : i32, i32, i32
  }
}

</mosaic_0001>

<bundles_post_ra>
// kernel: bilstm_twoff_forward.5
= control target key start
LH: loop header
LB: loop body
LE: loop exit
PB: predicated region body
PF: predicated region fallthrough
CT: control target
= control target key end

     0   :  { %vm46_vm0 = vcmask 261120   ;;  %s790_s1 = inlined_call_operand.vmem [shape: f32[2,32,32], index: 1, kind: input, shape index: {}]   ;;  %s791_s0 = inlined_call_operand.vmem [shape: f32[2,64,32], index: 0, kind: input, shape index: {}]   ;;  %s792_s3 = inlined_call_operand.vmem [shape: f32[32,128], index: 3, kind: input, shape index: {}]   ;;  %s793_s2 = inlined_call_operand.vmem [shape: f32[1,32], index: 2, kind: input, shape index: {}]   ;;  %s794_s4 = inlined_call_operand.vmem [shape: f32[1,128], index: 4, kind: input, shape index: {}]   ;;  %s795_s5 = inlined_call_operand.vmem [shape: f32[64,128], index: 5, kind: output, shape index: {}]  }
   0x1   :  { %v491_v0 = vld [vmem:[%s790_s1 + $0x38] sm:$0xff]  ;;  %v490_v1 = vld [vmem:[%s790_s1 + $0x30] sm:$0xff]  ;;  %v484_v2 = vld [vmem:[%s791_s0 + $0x60] sm:$0xff] }
   0x2   :  { %614 = vmatprep.subr.mxu1 %v491_v0  ;;  %554 = vmatprep.subr.mxu0 %v491_v0  ;;  %v489_v3 = vld [vmem:[%s790_s1 + $0x28] sm:$0xff]  ;;  %v488_v4 = vld [vmem:[%s790_s1 + $0x20] sm:$0xff]  ;;  %v31_v6 = vld [vmem:[%s790_s1 + $0x18] sm:$0xff] }
   0x3   :  { %618 = vmatpush3.msra.mxu1 %v491_v0  ;;  %568 = vmatprep.mubr.msk.f32.mxu1 %vm46_vm0, %v484_v2  ;;  %v485_v5 = vld [vmem:[%s791_s0 + $0x68] sm:$0xff]  ;;  %v486_v7 = vld [vmem:[%s791_s0 + $0x70] sm:$0xff]  ;;  %v480_v9 = vld [vmem:[%s791_s0 + $0x40] sm:$0xff] }
   0x4   :  { %615 = vmatprep.subr.mxu1 %v490_v1  ;;  %555 = vmatpush3.msra.mxu0 %v491_v0  ;;  %v30_v8 = vld [vmem:[%s790_s1 + $0x10] sm:$0xff]  ;;  %v487_v10 = vld [vmem:[%s791_s0 + $0x78] sm:$0xff]  ;;  %v29_v11 = vld [vmem:[%s790_s1 + $0x8] sm:$0xff] }
   0x5   :  { %619 = vmatpush3.msra.mxu1 %v490_v1  ;;  %556 = vmatprep.subr.mxu0 %v490_v1  ;;  %v481_v12 = vld [vmem:[%s791_s0 + $0x48] sm:$0xff]  ;;  %v28_v13 = vld [vmem:[%s790_s1] sm:$0xff]  ;;  %v482_v15 = vld [vmem:[%s791_s0 + $0x50] sm:$0xff] }
   0x6   :  { %616 = vmatprep.subr.mxu1 %v489_v3  ;;  %557 = vmatpush3.msra.mxu0 %v490_v1  ;;  %v20_v14 = vld [vmem:[%s791_s0] sm:$0xff]  ;;  %v21_v16 = vld [vmem:[%s791_s0 + $0x8] sm:$0xff]  ;;  %v483_v17 = vld [vmem:[%s791_s0 + $0x58] sm:$0xff] }
   0x7   :  { %620 = vmatpush3.msra.mxu1 %v489_v3  ;;  %558 = vmatprep.subr.mxu0 %v489_v3  ;;  %v22_v18 = vld [vmem:[%s791_s0 + $0x10] sm:$0xff]  ;;  %v23_v19 = vld [vmem:[%s791_s0 + $0x18] sm:$0xff]  ;;  %v24_v20 = vld [vmem:[%s791_s0 + $0x20] sm:$0xff] }
   0x8   :  { %617 = vmatprep.subr.mxu1 %v488_v4  ;;  %559 = vmatpush3.msra.mxu0 %v489_v3  ;;  %v25_v21 = vld [vmem:[%s791_s0 + $0x28] sm:$0xff]  ;;  %v26_v22 = vld [vmem:[%s791_s0 + $0x30] sm:$0xff]  ;;  %v27_v23 = vld [vmem:[%s791_s0 + $0x38] sm:$0xff] }
   0x9   :  { %621 = vmatpush3.msra.mxu1 %v488_v4  ;;  %560 = vmatprep.subr.mxu0 %v488_v4  ;;  %v331_v24 = vld [vmem:[%s792_s3 + $0x18] sm:$0xff]  ;;  %v330_v25 = vld [vmem:[%s792_s3 + $0x10] sm:$0xff]  ;;  %v329_v26 = vld [vmem:[%s792_s3 + $0x8] sm:$0xff] }
   0xa   :  { %569 = vmatmul.mubr.msk.f32.vlgmr.msra.gmra.mxu1 %vm46_vm0, %v485_v5  ;;  %574 = vmatprep.subr.mxu1 %v31_v6  ;;  %v328_v27 = vld [vmem:[%s792_s3] sm:$0xff] }
   0xb   :  { %575 = vmatpush3.msra.mxu1 %v31_v6  ;;  %571 = vmatprep.mubr.msk.f32.mxu1 %vm46_vm0, %v486_v7  ;;  %v508_v36 = vld [vmem:[%s793_s2] ss:$0 sm:$0xff] }
   0xc   :  { %576 = vmatprep.subr.mxu1 %v30_v8  ;;  %561 = vmatpush3.msra.mxu0 %v488_v4  ;;  %v509_v5 = vld [vmem:[%s794_s4] ss:$0 sm:$0xff] }
   0xd   :  { %577 = vmatpush3.msra.mxu1 %v30_v8  ;;  %562 = vmatprep.mubr.msk.f32.mxu0 %vm46_vm0, %v480_v9 }
   0xe   :  { %572 = vmatmul.mubr.msk.f32.gmra.mxu1 %vm46_vm0, %v487_v10  ;;  %578 = vmatprep.subr.mxu1 %v29_v11 }
   0xf   :  { %579 = vmatpush3.msra.mxu1 %v29_v11  ;;  %563 = vmatmul.mubr.msk.f32.vlgmr.msra.gmra.mxu0 %vm46_vm0, %v481_v12 }
  0x10   :  { %580 = vmatprep.subr.mxu1 %v28_v13  ;;  %582 = vmatprep.mubr.msk.f32.mxu1 %vm46_vm0, %v20_v14 }
  0x11   :  { %581 = vmatpush3.msra.mxu1 %v28_v13  ;;  %565 = vmatprep.mubr.msk.f32.mxu0 %vm46_vm0, %v482_v15 }
  0x12   :  { %583 = vmatmul.mubr.msk.f32.vlgmr.msra.gmra.mxu1 %vm46_vm0, %v21_v16  ;;  %594 = vmatprep.subr.mxu0 %v331_v24 }
  0x13   :  { %566 = vmatmul.mubr.msk.f32.gmra.mxu0 %vm46_vm0, %v483_v17  ;;  %585 = vmatprep.mubr.msk.f32.mxu1 %vm46_vm0, %v22_v18 }
  0x14   :  { %595 = vmatpush3.msra.mxu0 %v331_v24 }
  0x15   :  { %596 = vmatprep.subr.mxu0 %v330_v25 }
  0x16   :  { %586 = vmatmul.mubr.msk.f32.gmra.mxu1 %vm46_vm0, %v23_v19  ;;  %597 = vmatpush3.msra.mxu0 %v330_v25 }
  0x17   :  { %588 = vmatprep.mubr.msk.f32.mxu1 %vm46_vm0, %v24_v20  ;;  %598 = vmatprep.subr.mxu0 %v329_v26 }
  0x18   :  { %599 = vmatpush3.msra.mxu0 %v329_v26 }
  0x19   :  { %600 = vmatprep.subr.mxu0 %v328_v27 }
  0x1a   :  { %589 = vmatmul.mubr.msk.f32.gmra.mxu1 %vm46_vm0, %v25_v21  ;;  %601 = vmatpush3.msra.mxu0 %v328_v27 }
  0x1b   :  { %591 = vmatprep.mubr.msk.f32.mxu1 %vm46_vm0, %v26_v22 }
  0x1e   :  { %592 = vmatmul.mubr.msk.f32.gmra.mxu1 %vm46_vm0, %v27_v23 }
  0xca   :  { %v570_v28 = vpop.f32.mrf.mxu1 }
  0xcc   :  { %v157_v29 = vpop.f32.mrf.mxu1 }
  0xce   :  { %v573_v30 = vpop.f32.mrf.mxu1 }
  0xcf   :  { %v564_v31 = vpop.f32.mrf.mxu0 }
  0xd0   :  { %v167_v32 = vpop.f32.mrf.mxu1 }
  0xd1   :  { %v137_v33 = vpop.f32.mrf.mxu0 }
  0xd2   :  { %v584_v34 = vpop.f32.mrf.mxu1 }
  0xd3   :  { %v272_v35 = vadd.f32 %v584_v34, %v564_v31  ;;  %v567_v38 = vpop.f32.mrf.mxu0 }
  0xd4   :  { %v266_v37 = vpop.f32.mrf.mxu1 }
  0xd5   :  { %v267_v39 = vadd.f32 %v266_v37, %v137_v33  ;;  %v313_v40 = vadd.f32 %v508_v36, %v272_v35  ;;  %v147_v44 = vpop.f32.mrf.mxu0 }
  0xd6   :  { %v587_v41 = vpop.f32.mrf.mxu1 }
  0xd7   :  { %v312_v42 = vadd.f32 %v508_v36, %v267_v39  ;;  %v282_v43 = vadd.f32 %v587_v41, %v567_v38  ;;  %v321_v48 = vmax.f32 %v313_v40, 0.0 }
  0xd8   :  { %v276_v45 = vpop.f32.mrf.mxu1 }
  0xd9   :  { %v320_v46 = vmax.f32 %v312_v42, 0.0  ;;  %v277_v47 = vadd.f32 %v276_v45, %v147_v44  ;;  %v315_v49 = vadd.f32 %v508_v36, %v282_v43 }
  0xda   :  { %v590_v50 = vpop.f32.mrf.mxu1 }
  0xdb   :  { %v314_v51 = vadd.f32 %v508_v36, %v277_v47  ;;  %v292_v52 = vadd.f32 %v590_v50, %v570_v28  ;;  %602 = vmatprep.mubr.msk.f32.mxu0 %vm46_vm0, %v320_v46  ;;  %v323_v56 = vmax.f32 %v315_v49, 0.0 }
  0xdc   :  { %v286_v53 = vpop.f32.mrf.mxu1  ;;  %603 = vmatmul.mubr.msk.f32.vlgmr.msra.gmra.mxu0 %vm46_vm0, %v321_v48 }
  0xdd   :  { %v322_v54 = vmax.f32 %v314_v51, 0.0  ;;  %v287_v55 = vadd.f32 %v286_v53, %v157_v29  ;;  %v317_v57 = vadd.f32 %v508_v36, %v292_v52 }
  0xde   :  { %v593_v58 = vpop.f32.mrf.mxu1 }
  0xdf   :  { %v316_v59 = vadd.f32 %v508_v36, %v287_v55  ;;  %v302_v60 = vadd.f32 %v593_v58, %v573_v30  ;;  %605 = vmatprep.mubr.msk.f32.mxu0 %vm46_vm0, %v322_v54  ;;  %v325_v0 = vmax.f32 %v317_v57, 0.0 }
  0xe0   :  { %v296_v61 = vpop.f32.mrf.mxu1  ;;  %606 = vmatmul.mubr.msk.f32.gmra.mxu0 %vm46_vm0, %v323_v56 }
  0xe1   :  { %v324_v62 = vmax.f32 %v316_v59, 0.0  ;;  %v297_v63 = vadd.f32 %v296_v61, %v167_v32  ;;  %v319_v1 = vadd.f32 %v508_v36, %v302_v60 }
  0xe3   :  { %v318_v2 = vadd.f32 %v508_v36, %v297_v63  ;;  %608 = vmatprep.mubr.msk.f32.mxu0 %vm46_vm0, %v324_v62  ;;  %v327_v4 = vmax.f32 %v319_v1, 0.0 }
  0xe4   :  { %609 = vmatmul.mubr.msk.f32.gmra.mxu0 %vm46_vm0, %v325_v0 }
  0xe5   :  { %v326_v3 = vmax.f32 %v318_v2, 0.0 }
  0xe7   :  { %611 = vmatprep.mubr.msk.f32.mxu0 %vm46_vm0, %v326_v3 }
  0xe8   :  { %612 = vmatmul.mubr.msk.f32.gmra.mxu0 %vm46_vm0, %v327_v4 }
 0x19c   :  { %v604_v6 = vpop.f32.mrf.mxu0 }
 0x19d   :  { %v435_v7 = vadd.f32 %v604_v6, %v509_v5 }
 0x19e   :  { %v429_v8 = vpop.f32.mrf.mxu0 }
 0x19f   :  { %469 = vst [vmem:[%s795_s5 + $0x8] sm:$0xff] %v435_v7  ;;  %v430_v9 = vadd.f32 %v509_v5, %v429_v8 }
 0x1a0   :  { %v607_v10 = vpop.f32.mrf.mxu0 }
 0x1a1   :  { %468 = vst [vmem:[%s795_s5] sm:$0xff] %v430_v9  ;;  %v445_v11 = vadd.f32 %v607_v10, %v509_v5 }
 0x1a2   :  { %v439_v12 = vpop.f32.mrf.mxu0 }
 0x1a3   :  { %471 = vst [vmem:[%s795_s5 + $0x18] sm:$0xff] %v445_v11  ;;  %v440_v13 = vadd.f32 %v509_v5, %v439_v12 }
 0x1a4   :  { %v610_v14 = vpop.f32.mrf.mxu0 }
 0x1a5   :  { %470 = vst [vmem:[%s795_s5 + $0x10] sm:$0xff] %v440_v13  ;;  %v455_v15 = vadd.f32 %v610_v14, %v509_v5 }
 0x1a6   :  { %v449_v16 = vpop.f32.mrf.mxu0 }
 0x1a7   :  { %473 = vst [vmem:[%s795_s5 + $0x28] sm:$0xff] %v455_v15  ;;  %v450_v17 = vadd.f32 %v509_v5, %v449_v16 }
 0x1a8   :  { %v613_v18 = vpop.f32.mrf.mxu0 }
 0x1a9   :  { %472 = vst [vmem:[%s795_s5 + $0x20] sm:$0xff] %v450_v17  ;;  %v465_v19 = vadd.f32 %v613_v18, %v509_v5 }
 0x1aa   :  { %v459_v20 = vpop.f32.mrf.mxu0 }
 0x1ab   :  { %475 = vst [vmem:[%s795_s5 + $0x38] sm:$0xff] %v465_v19  ;;  %v460_v21 = vadd.f32 %v509_v5, %v459_v20 }
 0x1ad   :  { %474 = vst [vmem:[%s795_s5 + $0x30] sm:$0xff] %v460_v21 }

// kernel: bilstm_twoff_forward.3
= control target key start
LH: loop header
LB: loop body
LE: loop exit
PB: predicated region body
PF: predicated region fallthrough
CT: control target
= control target key end

     0   :  { %s1886_s15 = smov 0   ;;  %s1888_s16 = smov 0   ;;  %s2169_s0 = inlined_call_operand.vmem [shape: f32[1,64,16], index: 0, kind: input, shape index: {}]   ;;  %s2170_s1 = inlined_call_operand.vmem [shape: f32[2,1,16,128], index: 1, kind: input, shape index: {}]   ;;  %s2171_s2 = inlined_call_operand.vmem [shape: f32[2,1,128], index: 2, kind: input, shape index: {}]   ;;  %s2172_s3 = inlined_call_operand.vmem [shape: f32[2,32,128], index: 3, kind: input, shape index: {}]   ;;  %s2173_s4 = inlined_call_operand.vmem [shape: f32[2,64,32], index: 4, kind: output, shape index: {}]  }
   0x1   :  { %s1890_s17 = smov 0  }
   0x2 LB: > { %s26_s18 = sadd.s32 1, %s1850_s16  ;;  %p1540_p0 = scmp.ge.s32.totalorder %s1854_s17, 1  ;;  %s1854_s17 = sphi %s1890_s17, %s14_s17   ;;  %s1850_s16 = sphi %s1888_s16, %s2175_s16   ;;  %s1846_s15 = sphi %s1886_s15, %s2174_s15  }
   0x3   : > { %p28_p1 = scmp.ge.s32.totalorder %s26_s18, 2  ;;  %p235_p2 = scmp.lt.s32.totalorder %s1854_s17, 3 }
   0x5   : > { %s2177_s18 = smov (%p28_p1, %s26_s18), 0  ;;  %p236_p3 = pnand %p1540_p0, %p235_p2 }
   0x6   : > { %p304_p4 = scmp.lt.s32.totalorder (!%p236_p3), %s1846_s15, 1  ;;  %p505_p5 = scmp.eq.s32.totalorder (!%p236_p3), %s1846_s15, 0 }
   0x7   : > { %239 = sbr.rel (%p236_p3) target bundleno = 5558 (0x15b6), region = 36  ;;  %s1859_s30 = smov (!%p236_p3), 64  }
   0xc   : > { %v337_v0 = vld [vmem:[%s2169_s0] sm:$0xff]  ;;  %vm354_vm0 = vcmask 130048   ;;  %v1856_v1 = vmov 0.0   ;;  %vm500_vm1 = vcmask 261120   ;;  %s1913_s21 = scalar_select %p304_p4, %s1846_s15, 1  ;;  %vm1857_vm2 = vmmov 0  }
   0xd   : > { %1639 = vmatprep.mubr.msk.f32.mxu0 %vm354_vm0, %v337_v0  ;;  %1651 = vmatprep.subr.mxu1 %v1856_v1  ;;  %501 = vst.msk [vmem:[#allocation3] sm:$0xff] %vm500_vm1, %v1856_v1  ;;  %502 = vst.msk [vmem:[#allocation4] sm:$0xff] %vm500_vm1, %v1856_v1  ;;  %v338_v6 = vld [vmem:[%s2169_s0 + $0x8] sm:$0xff]  ;;  %v339_v8 = vld [vmem:[%s2169_s0 + $0x10] sm:$0xff]  ;;  %s2057_s13 = scalar_select %p505_p5, 2, 5 }
   0xe   : > { %1659 = vmatprep.mubr.msk.f32.mxu1 %vm1857_vm2, %v1856_v1  ;;  %s1582_s22 = sshll.u32 %s1913_s21, 4  ;;  %s1583_s23 = sshll.u32 %s1913_s21, 5  ;;  %v340_v11 = vld [vmem:[%s2169_s0 + $0x18] sm:$0xff]  ;;  %v341_v12 = vld [vmem:[%s2169_s0 + $0x20] sm:$0xff]  ;;  %v342_v13 = vld [vmem:[%s2169_s0 + $0x28] sm:$0xff] }
   0xf   : > { %s308_s26 = scalar_lea.vmem %s2170_s1, %s1582_s22  ;;  %s316_s29 = scalar_lea.vmem %s2172_s3, %s1583_s23  ;;  %v343_v14 = vld [vmem:[%s2169_s0 + $0x30] sm:$0xff]  ;;  %v344_v15 = vld [vmem:[%s2169_s0 + $0x38] sm:$0xff] }
  0x10   : > { %v346_v2 = vld [vmem:[%s308_s26 + $0x8] sm:$0xff]  ;;  %v345_v3 = vld [vmem:[%s308_s26] sm:$0xff]  ;;  %v1929_v4 = vld [vmem:[%s316_s29 + $0x18] sm:$0xff]  ;;  %s311_s25 = scalar_lea.vmem %s2171_s2, %s1913_s21  ;;  %s1584_s5 = sshll.u32 %s1913_s21, 6 }
  0x11   : > { %1635 = vmatprep.subr.mxu0 %v346_v2  ;;  %1652 = vmatpush3.msra.mxu1 %v1929_v4  ;;  %v1932_v5 = vld [vmem:[%s316_s29 + $0x10] sm:$0xff]  ;;  %v1938_v7 = vld [vmem:[%s316_s29 + $0x8] sm:$0xff]  ;;  %v1945_v9 = vld [vmem:[%s316_s29] sm:$0xff]  ;;  %s2002_s26 = scalar_select %p505_p5, 0, 7 }
  0x12   : > { %1636 = vmatpush3.msra.mxu0 %v346_v2  ;;  %1653 = vmatprep.subr.mxu1 %v1856_v1  ;;  %v1547_v16 = vld [vmem:[%s311_s25] ss:$0 sm:$0xff]  ;;  %s1858_s29 = smov 32   ;;  %s2016_s8 = scalar_lea.vmem %s2173_s4, %s1584_s5 }
  0x13   : > { %1637 = vmatprep.subr.mxu0 %v345_v3  ;;  %1654 = vmatpush3.msra.mxu1 %v1932_v5  ;;  %s1556_s27 = sshll.u32 %s2002_s26, 3  ;;  %s1562_s14 = sshll.u32 %s2057_s13, 3 }
  0x14   : > { %1638 = vmatpush3.msra.mxu0 %v345_v3  ;;  %1655 = vmatprep.subr.mxu1 %v1856_v1  ;;  %v503_v10 = vld [vmem:[#allocation3] sm:$0xff]  ;;  %s508_s28 = scalar_lea.vmem [#allocation2], %s1556_s27  ;;  %v504_v38 = vld [vmem:[#allocation4] sm:$0xff]  ;;  %s617_s9 = scalar_lea.vmem %s2016_s8, %s1556_s27 }
  0x15   : > { %1640 = vmatmul.mubr.msk.f32.vlgmr.msra.gmra.mxu0 %vm354_vm0, %v338_v6  ;;  %1656 = vmatpush3.msra.mxu1 %v1938_v7  ;;  %s2035_s21 = scalar_select %p505_p5, 1, 6 }
  0x16   : > { %1642 = vmatprep.mubr.msk.f32.mxu0 %vm354_vm0, %v339_v8  ;;  %1657 = vmatprep.subr.mxu1 %v1856_v1  ;;  %s728_s19 = scalar_lea.vmem [#allocation2], %s1562_s14  ;;  %s831_s20 = scalar_lea.vmem %s2016_s8, %s1562_s14 }
  0x17   : > { %1658 = vmatpush3.msra.mxu1 %v1945_v9  ;;  %1673 = vmatprep.subr.mxu0 %v1856_v1  ;;  %s1559_s10 = sshll.u32 %s2035_s21, 3  ;;  %s1860_s15 = smov 96  }
  0x18   : > { %1660 = vmatmul.mubr.msk.f32.vlgmr.msra.gmra.mxu1 %vm500_vm1, %v503_v10  ;;  %1662 = vmatprep.subr.mxu1 %v1856_v1  ;;  %s621_s11 = scalar_lea.vmem [#allocation2], %s1559_s10  ;;  %s724_s12 = scalar_lea.vmem %s2016_s8, %s1559_s10 }
  0x19   : > { %1643 = vmatmul.mubr.msk.f32.gmra.mxu0 %vm354_vm0, %v340_v11  ;;  %1663 = vmatpush3.msra.mxu1 %v1929_v4  ;;  %s2079_s22 = scalar_select %p505_p5, 3, 4 }
  0x1a   : > { %1645 = vmatprep.mubr.msk.f32.mxu0 %vm354_vm0, %v341_v12  ;;  %1664 = vmatprep.subr.mxu1 %v1856_v1  ;;  %s2100_s26 = scalar_select %p505_p5, 4, 3 }
  0x1b   : > { %1665 = vmatpush3.msra.mxu1 %v1932_v5  ;;  %1670 = vmatprep.mubr.msk.f32.mxu1 %vm1857_vm2, %v1856_v1  ;;  %s1565_s23 = sshll.u32 %s2079_s22, 3 }
  0x1c   : > { %1666 = vmatprep.subr.mxu1 %v1856_v1  ;;  %1674 = vmatpush3.msra.mxu0 %v1929_v4  ;;  %s835_s24 = scalar_lea.vmem [#allocation2], %s1565_s23  ;;  %s938_s25 = scalar_lea.vmem %s2016_s8, %s1565_s23 }
  0x1d   : > { %1646 = vmatmul.mubr.msk.f32.gmra.mxu0 %vm354_vm0, %v342_v13  ;;  %1667 = vmatpush3.msra.mxu1 %v1938_v7  ;;  %s1568_s27 = sshll.u32 %s2100_s26, 3 }
  0x1e   : > { %1648 = vmatprep.mubr.msk.f32.mxu0 %vm354_vm0, %v343_v14  ;;  %1668 = vmatprep.subr.mxu1 %v1856_v1  ;;  %s1045_s5 = scalar_lea.vmem %s2016_s8, %s1568_s27 }
  0x1f   : > { %1669 = vmatpush3.msra.mxu1 %v1945_v9  ;;  %1675 = vmatprep.subr.mxu0 %v1856_v1  ;;  %s2121_s6 = scalar_select %p505_p5, 5, 2 }
  0x20   : > { %1676 = vmatpush3.msra.mxu0 %v1932_v5  ;;  %1684 = vmatprep.subr.mxu1 %v1856_v1  ;;  %s2133_s10 = scalar_select %p505_p5, 6, 1 }
  0x21   : > { %1649 = vmatmul.mubr.msk.f32.gmra.mxu0 %vm354_vm0, %v344_v15  ;;  %1677 = vmatprep.subr.mxu0 %v1856_v1  ;;  %s1571_s7 = sshll.u32 %s2121_s6, 3 }
  0x22   : > { %1678 = vmatpush3.msra.mxu0 %v1938_v7  ;;  %1681 = vmatprep.mubr.msk.f32.mxu0 %vm1857_vm2, %v1856_v1  ;;  %s1152_s21 = scalar_lea.vmem %s2016_s8, %s1571_s7 }
  0x23   : > { %1679 = vmatprep.subr.mxu0 %v1856_v1  ;;  %s2145_s14 = scalar_select %p505_p5, 7, 0 }
  0x24   : > { %1680 = vmatpush3.msra.mxu0 %v1945_v9 }
  0x25   : > { %1695 = vmatprep.subr.mxu0 %v1856_v1 }
  0xd5   : > { %v1641_v17 = vpop.f32.mrf.mxu0 }
  0xd6   : > { %v451_v18 = vadd.f32 %v1641_v17, %v1547_v16 }
  0xd7   : > { %v445_v19 = vpop.f32.mrf.mxu0 }
  0xd8   : > { %485 = vst [vmem:[#allocation2 + $0x8] sm:$0xff] %v451_v18  ;;  %v446_v20 = vadd.f32 %v1547_v16, %v445_v19  ;;  %v580_v21 = vpop.f32.mrf.mxu1 }
  0xd9   : > { %v1644_v22 = vpop.f32.mrf.mxu0 }
  0xda   : > { %484 = vst [vmem:[#allocation2] sm:$0xff] %v446_v20  ;;  %v461_v23 = vadd.f32 %v1644_v22, %v1547_v16  ;;  %v1661_v24 = vpop.f32.mrf.mxu1 }
  0xdb   : > { %v455_v25 = vpop.f32.mrf.mxu0 }
  0xdc   : > { %487 = vst [vmem:[#allocation2 + $0x18] sm:$0xff] %v461_v23  ;;  %v456_v26 = vadd.f32 %v1547_v16, %v455_v25 }
  0xdd   : > { %v1647_v27 = vpop.f32.mrf.mxu0 }
  0xde   : > { %486 = vst [vmem:[#allocation2 + $0x10] sm:$0xff] %v456_v26  ;;  %v471_v28 = vadd.f32 %v1647_v27, %v1547_v16 }
  0xdf   : > { %v465_v29 = vpop.f32.mrf.mxu0 }
  0xe0   : > { %489 = vst [vmem:[#allocation2 + $0x28] sm:$0xff] %v471_v28  ;;  %v466_v30 = vadd.f32 %v1547_v16, %v465_v29 }
  0xe1   : > { %v1650_v31 = vpop.f32.mrf.mxu0 }
  0xe2   : > { %488 = vst [vmem:[#allocation2 + $0x20] sm:$0xff] %v466_v30  ;;  %v481_v32 = vadd.f32 %v1650_v31, %v1547_v16 }
  0xe3   : > { %v475_v33 = vpop.f32.mrf.mxu0 }
  0xe4   : > { %491 = vst [vmem:[#allocation2 + $0x38] sm:$0xff] %v481_v32  ;;  %v476_v34 = vadd.f32 %v1547_v16, %v475_v33 }
  0xe6   : > { %490 = vst [vmem:[#allocation2 + $0x30] sm:$0xff] %v476_v34 }
  0xed   : > { %v509_v35 = vld [vmem:[%s508_s28] sm:$0xff]  ;;  %s942_s28 = scalar_lea.vmem [#allocation2], %s1568_s27 }
  0xee   : > { %v584_v36 = vadd.f32 %v580_v21, %v509_v35  ;;  %v622_v53 = vld [vmem:[%s621_s11] sm:$0xff]  ;;  %s1574_s11 = sshll.u32 %s2133_s10, 3 }
  0xef   : > { %v729_v12 = vld [vmem:[%s728_s19] sm:$0xff]  ;;  %s1259_s13 = scalar_lea.vmem %s2016_s8, %s1574_s11  ;;  %s1577_s19 = sshll.u32 %s2145_s14, 3 }
  0xf0   : > { %1768 = vtanh.f32 %v584_v36  ;;  %v1558_v39 = vmul.f32 -1.442695, %v584_v36  ;;  %v836_v30 = vld [vmem:[%s835_s24] sm:$0xff]  ;;  %s1366_s22 = scalar_lea.vmem %s2016_s8, %s1577_s19 }
  0xf2   : > { %1770 = vpow2.f32 %v1558_v39 }
  0xfd   : > { %v1769_v37 = vpop.eup %1768 }
  0xfe   : > { %598 = vrot.lane.b32.xlu0 %v1769_v37, %s1858_s29 }
  0xff   : > { %v1771_v40 = vpop.eup %1770 }
 0x100   : > { %v588_v41 = vadd.f32 1.0, %v1771_v40 }
 0x102   : > { %593 = vrot.lane.b32.xlu0 %v504_v38, %s1858_s29  ;;  %1772 = vrcp.f32 %v588_v41 }
 0x10f   : > { %v1773_v42 = vpop.eup %1772 }
 0x170   : > { %v599_v43 = vpop.permute.xlu0 %598 }
 0x171   : > { %v601_v44 = vmul.f32 %v1773_v42, %v599_v43 }
 0x173   : > { %603 = vrot.lane.b32.xlu1 %v601_v44, %s1858_s29 }
 0x174   : > { %v594_v45 = vpop.permute.xlu0 %593 }
 0x175   : > { %v596_v46 = vmul.f32 %v1773_v42, %v594_v45 }
 0x1e5   : > { %v604_v47 = vpop.permute.xlu1 %603 }
 0x1e6   : > { %v606_v48 = vadd.f32 %v604_v47, %v596_v46 }
 0x1e8   : > { %1774 = vtanh.f32 %v606_v48 }
 0x1f5   : > { %v1775_v49 = vpop.eup %1774 }
 0x1f6   : > { %609 = vrot.lane.b32.xlu1 %v1775_v49, %s1858_s29 }
 0x268   : > { %v610_v50 = vpop.permute.xlu1 %609 }
 0x269   : > { %v612_v51 = vmul.f32 %v1773_v42, %v610_v50 }
 0x26b   : > { %614 = vrot.lane.b32.xlu0 %v612_v51, %s1859_s30 }
 0x2dd   : > { %v615_v52 = vpop.permute.xlu0 %614 }
 0x2de   : > { %618 = vst.msk [vmem:[%s617_s9] sm:$0xff] %vm500_vm1, %v615_v52  ;;  %1671 = vmatmul.mubr.msk.f32.vlgmr.msra.gmra.mxu1 %vm500_vm1, %v615_v52  ;;  %s1049_s9 = scalar_lea.vmem [#allocation2], %s1571_s7 }
 0x2df   : > { %1685 = vmatpush3.msra.mxu1 %v1929_v4  ;;  %1692 = vmatprep.mubr.msk.f32.mxu1 %vm1857_vm2, %v1856_v1 }
 0x2e0   : > { %1686 = vmatprep.subr.mxu1 %v1856_v1 }
 0x2e1   : > { %1687 = vmatpush3.msra.mxu1 %v1932_v5 }
 0x2e2   : > { %1688 = vmatprep.subr.mxu1 %v1856_v1 }
 0x2e3   : > { %1689 = vmatpush3.msra.mxu1 %v1938_v7 }
 0x2e4   : > { %1690 = vmatprep.subr.mxu1 %v1856_v1 }
 0x2e5   : > { %1691 = vmatpush3.msra.mxu1 %v1945_v9 }
 0x2e6   : > { %1706 = vmatprep.subr.mxu1 %v1856_v1 }
 0x39e   : > { %v691_v54 = vpop.f32.mrf.mxu1 }
 0x39f   : > { %v695_v55 = vadd.f32 %v691_v54, %v622_v53 }
 0x3a0   : > { %v1672_v56 = vpop.f32.mrf.mxu1 }
 0x3a1   : > { %1776 = vtanh.f32 %v695_v55  ;;  %v1561_v58 = vmul.f32 -1.442695, %v695_v55 }
 0x3a3   : > { %1778 = vpow2.f32 %v1561_v58 }
 0x3ae   : > { %v1777_v57 = vpop.eup %1776 }
 0x3af   : > { %705 = vrot.lane.b32.xlu1 %v1777_v57, %s1858_s29 }
 0x3b0   : > { %v1779_v59 = vpop.eup %1778 }
 0x3b1   : > { %v699_v60 = vadd.f32 1.0, %v1779_v59 }
 0x3b3   : > { %1780 = vrcp.f32 %v699_v60 }
 0x3c0   : > { %v1781_v61 = vpop.eup %1780 }
 0x3c1   : > { %v703_v0 = vmul.f32 %v1781_v61, %v606_v48  ;;  %v943_v48 = vld [vmem:[%s942_s28] sm:$0xff] }
 0x421   : > { %v706_v62 = vpop.permute.xlu1 %705 }
 0x422   : > { %v708_v63 = vmul.f32 %v1781_v61, %v706_v62 }
 0x424   : > { %710 = vrot.lane.b32.xlu0 %v708_v63, %s1858_s29 }
 0x496   : > { %v711_v2 = vpop.permute.xlu0 %710 }
 0x497   : > { %v713_v3 = vadd.f32 %v711_v2, %v703_v0 }
 0x499   : > { %1782 = vtanh.f32 %v713_v3 }
 0x4a6   : > { %v1783_v6 = vpop.eup %1782 }
 0x4a7   : > { %716 = vrot.lane.b32.xlu1 %v1783_v6, %s1858_s29 }
 0x519   : > { %v717_v8 = vpop.permute.xlu1 %716 }
 0x51a   : > { %v719_v10 = vmul.f32 %v1781_v61, %v717_v8 }
 0x51c   : > { %721 = vrot.lane.b32.xlu0 %v719_v10, %s1859_s30 }
 0x58e   : > { %v722_v11 = vpop.permute.xlu0 %721 }
 0x58f   : > { %725 = vst.msk [vmem:[%s724_s12] sm:$0xff] %vm500_vm1, %v722_v11  ;;  %1682 = vmatmul.mubr.msk.f32.vlgmr.msra.gmra.mxu0 %vm500_vm1, %v722_v11  ;;  %s1156_s12 = scalar_lea.vmem [#allocation2], %s1574_s11 }
 0x590   : > { %1696 = vmatpush3.msra.mxu0 %v1929_v4  ;;  %1703 = vmatprep.mubr.msk.f32.mxu0 %vm1857_vm2, %v1856_v1 }
 0x591   : > { %1697 = vmatprep.subr.mxu0 %v1856_v1 }
 0x592   : > { %1698 = vmatpush3.msra.mxu0 %v1932_v5 }
 0x593   : > { %1699 = vmatprep.subr.mxu0 %v1856_v1 }
 0x594   : > { %1700 = vmatpush3.msra.mxu0 %v1938_v7 }
 0x595   : > { %1701 = vmatprep.subr.mxu0 %v1856_v1 }
 0x596   : > { %1702 = vmatpush3.msra.mxu0 %v1945_v9 }
 0x597   : > { %1717 = vmatprep.subr.mxu0 %v1856_v1 }
 0x64f   : > { %v798_v13 = vpop.f32.mrf.mxu0 }
 0x650   : > { %v802_v14 = vadd.f32 %v798_v13, %v729_v12 }
 0x651   : > { %v1683_v15 = vpop.f32.mrf.mxu0 }
 0x652   : > { %1784 = vtanh.f32 %v802_v14  ;;  %v1564_v17 = vmul.f32 -1.442695, %v802_v14 }
 0x654   : > { %1786 = vpow2.f32 %v1564_v17 }
 0x65f   : > { %v1785_v16 = vpop.eup %1784 }
 0x660   : > { %812 = vrot.lane.b32.xlu1 %v1785_v16, %s1858_s29 }
 0x661   : > { %v1787_v18 = vpop.eup %1786 }
 0x662   : > { %v806_v19 = vadd.f32 1.0, %v1787_v18 }
 0x664   : > { %1788 = vrcp.f32 %v806_v19 }
 0x671   : > { %v1789_v20 = vpop.eup %1788 }
 0x672   : > { %v810_v23 = vmul.f32 %v1789_v20, %v713_v3 }
 0x6d2   : > { %v813_v21 = vpop.permute.xlu1 %812 }
 0x6d3   : > { %v815_v22 = vmul.f32 %v1789_v20, %v813_v21 }
 0x6d5   : > { %817 = vrot.lane.b32.xlu0 %v815_v22, %s1858_s29 }
 0x747   : > { %v818_v24 = vpop.permute.xlu0 %817 }
 0x748   : > { %v820_v25 = vadd.f32 %v818_v24, %v810_v23 }
 0x74a   : > { %1790 = vtanh.f32 %v820_v25 }
 0x757   : > { %v1791_v26 = vpop.eup %1790 }
 0x758   : > { %823 = vrot.lane.b32.xlu1 %v1791_v26, %s1858_s29 }
 0x7ca   : > { %v824_v27 = vpop.permute.xlu1 %823 }
 0x7cb   : > { %v826_v28 = vmul.f32 %v1789_v20, %v824_v27  ;;  %v1157_v20 = vld [vmem:[%s1156_s12] sm:$0xff] }
 0x7cd   : > { %828 = vrot.lane.b32.xlu0 %v826_v28, %s1859_s30 }
 0x83f   : > { %v829_v29 = vpop.permute.xlu0 %828 }
 0x840   : > { %832 = vst.msk [vmem:[%s831_s20] sm:$0xff] %vm500_vm1, %v829_v29  ;;  %1693 = vmatmul.mubr.msk.f32.vlgmr.msra.gmra.mxu1 %vm500_vm1, %v829_v29  ;;  %s1263_s20 = scalar_lea.vmem [#allocation2], %s1577_s19 }
 0x841   : > { %1707 = vmatpush3.msra.mxu1 %v1929_v4  ;;  %1714 = vmatprep.mubr.msk.f32.mxu1 %vm1857_vm2, %v1856_v1 }
 0x842   : > { %1708 = vmatprep.subr.mxu1 %v1856_v1 }
 0x843   : > { %1709 = vmatpush3.msra.mxu1 %v1932_v5 }
 0x844   : > { %1710 = vmatprep.subr.mxu1 %v1856_v1 }
 0x845   : > { %1711 = vmatpush3.msra.mxu1 %v1938_v7 }
 0x846   : > { %1712 = vmatprep.subr.mxu1 %v1856_v1 }
 0x847   : > { %1713 = vmatpush3.msra.mxu1 %v1945_v9 }
 0x848   : > { %1728 = vmatprep.subr.mxu1 %v1856_v1 }
 0x900   : > { %v905_v31 = vpop.f32.mrf.mxu1 }
 0x901   : > { %v909_v32 = vadd.f32 %v905_v31, %v836_v30 }
 0x902   : > { %v1694_v33 = vpop.f32.mrf.mxu1 }
 0x903   : > { %1792 = vtanh.f32 %v909_v32  ;;  %v1567_v35 = vmul.f32 -1.442695, %v909_v32 }
 0x905   : > { %1794 = vpow2.f32 %v1567_v35 }
 0x910   : > { %v1793_v34 = vpop.eup %1792 }
 0x911   : > { %919 = vrot.lane.b32.xlu1 %v1793_v34, %s1858_s29 }
 0x912   : > { %v1795_v36 = vpop.eup %1794 }
 0x913   : > { %v913_v37 = vadd.f32 1.0, %v1795_v36 }
 0x915   : > { %1796 = vrcp.f32 %v913_v37 }
 0x922   : > { %v1797_v38 = vpop.eup %1796 }
 0x923   : > { %v917_v41 = vmul.f32 %v1797_v38, %v820_v25 }
 0x983   : > { %v920_v39 = vpop.permute.xlu1 %919 }
 0x984   : > { %v922_v40 = vmul.f32 %v1797_v38, %v920_v39 }
 0x986   : > { %924 = vrot.lane.b32.xlu0 %v922_v40, %s1858_s29 }
 0x9f8   : > { %v925_v42 = vpop.permute.xlu0 %924 }
 0x9f9   : > { %v927_v43 = vadd.f32 %v925_v42, %v917_v41 }
 0x9fb   : > { %1798 = vtanh.f32 %v927_v43 }
 0xa08   : > { %v1799_v44 = vpop.eup %1798 }
 0xa09   : > { %930 = vrot.lane.b32.xlu1 %v1799_v44, %s1858_s29 }
 0xa7b   : > { %v931_v45 = vpop.permute.xlu1 %930 }
 0xa7c   : > { %v933_v46 = vmul.f32 %v1797_v38, %v931_v45  ;;  %v1264_v38 = vld [vmem:[%s1263_s20] sm:$0xff] }
 0xa7e   : > { %935 = vrot.lane.b32.xlu0 %v933_v46, %s1859_s30 }
 0xaf0   : > { %v936_v47 = vpop.permute.xlu0 %935 }
 0xaf1   : > { %939 = vst.msk [vmem:[%s938_s25] sm:$0xff] %vm500_vm1, %v936_v47  ;;  %1704 = vmatmul.mubr.msk.f32.vlgmr.msra.gmra.mxu0 %vm500_vm1, %v936_v47 }
 0xaf2   : > { %1718 = vmatpush3.msra.mxu0 %v1929_v4  ;;  %1725 = vmatprep.mubr.msk.f32.mxu0 %vm1857_vm2, %v1856_v1 }
 0xaf3   : > { %1719 = vmatprep.subr.mxu0 %v1856_v1 }
 0xaf4   : > { %1720 = vmatpush3.msra.mxu0 %v1932_v5 }
 0xaf5   : > { %1721 = vmatprep.subr.mxu0 %v1856_v1 }
 0xaf6   : > { %1722 = vmatpush3.msra.mxu0 %v1938_v7 }
 0xaf7   : > { %1723 = vmatprep.subr.mxu0 %v1856_v1 }
 0xaf8   : > { %1724 = vmatpush3.msra.mxu0 %v1945_v9 }
 0xbb1   : > { %v1012_v49 = vpop.f32.mrf.mxu0 }
 0xbb2   : > { %v1016_v50 = vadd.f32 %v1012_v49, %v943_v48 }
 0xbb3   : > { %v1705_v51 = vpop.f32.mrf.mxu0 }
 0xbb4   : > { %1800 = vtanh.f32 %v1016_v50  ;;  %v1570_v53 = vmul.f32 -1.442695, %v1016_v50 }
 0xbb6   : > { %1802 = vpow2.f32 %v1570_v53 }
 0xbc1   : > { %v1801_v52 = vpop.eup %1800 }
 0xbc2   : > { %1026 = vrot.lane.b32.xlu1 %v1801_v52, %s1858_s29 }
 0xbc3   : > { %v1803_v54 = vpop.eup %1802 }
 0xbc4   : > { %v1020_v55 = vadd.f32 1.0, %v1803_v54 }
 0xbc6   : > { %1804 = vrcp.f32 %v1020_v55 }
 0xbd3   : > { %v1805_v56 = vpop.eup %1804 }
 0xbd4   : > { %v1024_v59 = vmul.f32 %v1805_v56, %v927_v43 }
 0xc34   : > { %v1027_v57 = vpop.permute.xlu1 %1026 }
 0xc35   : > { %v1029_v58 = vmul.f32 %v1805_v56, %v1027_v57 }
 0xc37   : > { %1031 = vrot.lane.b32.xlu0 %v1029_v58, %s1858_s29 }
 0xca9   : > { %v1032_v60 = vpop.permute.xlu0 %1031 }
 0xcaa   : > { %v1034_v61 = vadd.f32 %v1032_v60, %v1024_v59 }
 0xcac   : > { %1806 = vtanh.f32 %v1034_v61 }
 0xcb9   : > { %v1807_v62 = vpop.eup %1806 }
 0xcba   : > { %1037 = vrot.lane.b32.xlu1 %v1807_v62, %s1858_s29 }
 0xd2c   : > { %v1038_v63 = vpop.permute.xlu1 %1037 }
 0xd2d   : > { %v1040_v0 = vmul.f32 %v1805_v56, %v1038_v63 }
 0xd2f   : > { %1042 = vrot.lane.b32.xlu0 %v1040_v0, %s1859_s30 }
 0xda1   : > { %v1043_v2 = vpop.permute.xlu0 %1042 }
 0xda2   : > { %1046 = vst.msk [vmem:[%s1045_s5] sm:$0xff] %vm500_vm1, %v1043_v2  ;;  %1715 = vmatmul.mubr.msk.f32.vlgmr.msra.gmra.mxu1 %vm500_vm1, %v1043_v2 }
 0xda3   : > { %1729 = vmatpush3.msra.mxu1 %v1929_v4  ;;  %1736 = vmatprep.mubr.msk.f32.mxu1 %vm1857_vm2, %v1856_v1  ;;  %v1050_v4 = vld [vmem:[%s1049_s9] sm:$0xff] }
 0xda4   : > { %1730 = vmatprep.subr.mxu1 %v1856_v1 }
 0xda5   : > { %1731 = vmatpush3.msra.mxu1 %v1932_v5 }
 0xda6   : > { %1732 = vmatprep.subr.mxu1 %v1856_v1 }
 0xda7   : > { %1733 = vmatpush3.msra.mxu1 %v1938_v7 }
 0xda8   : > { %1734 = vmatprep.subr.mxu1 %v1856_v1 }
 0xda9   : > { %1735 = vmatpush3.msra.mxu1 %v1945_v9 }
 0xe62   : > { %v1119_v3 = vpop.f32.mrf.mxu1 }
 0xe63   : > { %v1123_v6 = vadd.f32 %v1119_v3, %v1050_v4 }
 0xe64   : > { %v1716_v8 = vpop.f32.mrf.mxu1 }
 0xe65   : > { %1808 = vtanh.f32 %v1123_v6  ;;  %v1573_v10 = vmul.f32 -1.442695, %v1123_v6 }
 0xe67   : > { %1810 = vpow2.f32 %v1573_v10 }
 0xe72   : > { %v1809_v5 = vpop.eup %1808 }
 0xe73   : > { %1133 = vrot.lane.b32.xlu1 %v1809_v5, %s1858_s29 }
 0xe74   : > { %v1811_v7 = vpop.eup %1810 }
 0xe75   : > { %v1127_v1 = vadd.f32 1.0, %v1811_v7 }
 0xe77   : > { %1812 = vrcp.f32 %v1127_v1 }
 0xe84   : > { %v1813_v9 = vpop.eup %1812 }
 0xe85   : > { %v1131_v13 = vmul.f32 %v1813_v9, %v1034_v61 }
 0xee5   : > { %v1134_v11 = vpop.permute.xlu1 %1133 }
 0xee6   : > { %v1136_v12 = vmul.f32 %v1813_v9, %v1134_v11 }
 0xee8   : > { %1138 = vrot.lane.b32.xlu0 %v1136_v12, %s1858_s29 }
 0xf5a   : > { %v1139_v14 = vpop.permute.xlu0 %1138 }
 0xf5b   : > { %v1141_v15 = vadd.f32 %v1139_v14, %v1131_v13 }
 0xf5d   : > { %1814 = vtanh.f32 %v1141_v15 }
 0xf6a   : > { %v1815_v16 = vpop.eup %1814 }
 0xf6b   : > { %1144 = vrot.lane.b32.xlu1 %v1815_v16, %s1858_s29 }
 0xfdd   : > { %v1145_v17 = vpop.permute.xlu1 %1144 }
 0xfde   : > { %v1147_v18 = vmul.f32 %v1813_v9, %v1145_v17 }
 0xfe0   : > { %1149 = vrot.lane.b32.xlu0 %v1147_v18, %s1859_s30 }
0x1052   : > { %v1150_v19 = vpop.permute.xlu0 %1149 }
0x1053   : > { %1153 = vst.msk [vmem:[%s1152_s21] sm:$0xff] %vm500_vm1, %v1150_v19  ;;  %1726 = vmatmul.mubr.msk.f32.vlgmr.msra.gmra.mxu0 %vm500_vm1, %v1150_v19 }
0x1113   : > { %v1226_v21 = vpop.f32.mrf.mxu0 }
0x1114   : > { %v1230_v22 = vadd.f32 %v1226_v21, %v1157_v20 }
0x1115   : > { %v1727_v23 = vpop.f32.mrf.mxu0 }
0x1116   : > { %1816 = vtanh.f32 %v1230_v22  ;;  %v1576_v25 = vmul.f32 -1.442695, %v1230_v22 }
0x1118   : > { %1818 = vpow2.f32 %v1576_v25 }
0x1123   : > { %v1817_v24 = vpop.eup %1816 }
0x1124   : > { %1240 = vrot.lane.b32.xlu1 %v1817_v24, %s1858_s29 }
0x1125   : > { %v1819_v26 = vpop.eup %1818 }
0x1126   : > { %v1234_v27 = vadd.f32 1.0, %v1819_v26 }
0x1128   : > { %1820 = vrcp.f32 %v1234_v27 }
0x1135   : > { %v1821_v28 = vpop.eup %1820 }
0x1136   : > { %v1238_v31 = vmul.f32 %v1821_v28, %v1141_v15 }
0x1196   : > { %v1241_v29 = vpop.permute.xlu1 %1240 }
0x1197   : > { %v1243_v30 = vmul.f32 %v1821_v28, %v1241_v29 }
0x1199   : > { %1245 = vrot.lane.b32.xlu0 %v1243_v30, %s1858_s29 }
0x120b   : > { %v1246_v32 = vpop.permute.xlu0 %1245 }
0x120c   : > { %v1248_v33 = vadd.f32 %v1246_v32, %v1238_v31 }
0x120e   : > { %1822 = vtanh.f32 %v1248_v33 }
0x121b   : > { %v1823_v34 = vpop.eup %1822 }
0x121c   : > { %1251 = vrot.lane.b32.xlu1 %v1823_v34, %s1858_s29 }
0x128e   : > { %v1252_v35 = vpop.permute.xlu1 %1251 }
0x128f   : > { %v1254_v36 = vmul.f32 %v1821_v28, %v1252_v35 }
0x1291   : > { %1256 = vrot.lane.b32.xlu0 %v1254_v36, %s1859_s30 }
0x1303   : > { %v1257_v37 = vpop.permute.xlu0 %1256 }
0x1304   : > { %1260 = vst.msk [vmem:[%s1259_s13] sm:$0xff] %vm500_vm1, %v1257_v37  ;;  %1737 = vmatmul.mubr.msk.f32.vlgmr.msra.gmra.mxu1 %vm500_vm1, %v1257_v37 }
0x13c4   : > { %v1333_v39 = vpop.f32.mrf.mxu1 }
0x13c5   : > { %v1337_v40 = vadd.f32 %v1333_v39, %v1264_v38 }
0x13c6   : > { %v1738_v41 = vpop.f32.mrf.mxu1 }
0x13c7   : > { %1824 = vtanh.f32 %v1337_v40  ;;  %v1579_v43 = vmul.f32 -1.442695, %v1337_v40 }
0x13c9   : > { %1826 = vpow2.f32 %v1579_v43 }
0x13d4   : > { %v1825_v42 = vpop.eup %1824 }
0x13d5   : > { %1347 = vrot.lane.b32.xlu1 %v1825_v42, %s1858_s29 }
0x13d6   : > { %v1827_v44 = vpop.eup %1826 }
0x13d7   : > { %v1341_v45 = vadd.f32 1.0, %v1827_v44 }
0x13d9   : > { %1828 = vrcp.f32 %v1341_v45 }
0x13e6   : > { %v1829_v46 = vpop.eup %1828 }
0x13e7   : > { %v1345_v49 = vmul.f32 %v1829_v46, %v1248_v33 }
0x1447   : > { %v1348_v47 = vpop.permute.xlu1 %1347 }
0x1448   : > { %v1350_v48 = vmul.f32 %v1829_v46, %v1348_v47 }
0x144a   : > { %1352 = vrot.lane.b32.xlu0 %v1350_v48, %s1858_s29 }
0x14bc   : > { %v1353_v50 = vpop.permute.xlu0 %1352 }
0x14bd   : > { %v1355_v51 = vadd.f32 %v1353_v50, %v1345_v49 }
0x14bf   : > { %1830 = vtanh.f32 %v1355_v51 }
0x14cc   : > { %v1831_v52 = vpop.eup %1830 }
0x14cd   : > { %1358 = vrot.lane.b32.xlu1 %v1831_v52, %s1858_s29 }
0x14d1   : > { %1370 = vrot.lane.b32.xlu1 %v1355_v51, %s1860_s15 }
0x153f   : > { %v1359_v53 = vpop.permute.xlu1 %1358 }
0x1540   : > { %v1361_v54 = vmul.f32 %v1829_v46, %v1359_v53 }
0x1542   : > { %1363 = vrot.lane.b32.xlu0 %v1361_v54, %s1859_s30 }
0x1543   : > { %v1371_v55 = vpop.permute.xlu1 %1370 }
0x1544   : > { %1373 = vst.msk [vmem:[#allocation4] sm:$0xff] %vm500_vm1, %v1371_v55 }
0x15b4   : > { %v1364_v56 = vpop.permute.xlu0 %1363 }
0x15b5   : > { %1367 = vst.msk [vmem:[%s1366_s22] sm:$0xff] %vm500_vm1, %v1364_v56  ;;  %1368 = vst.msk [vmem:[#allocation3] sm:$0xff] %vm500_vm1, %v1364_v56 }
0x15b6 PF: > { %s14_s17 = sadd.s32 1, %s1854_s17   ;;  %s2174_s15 = smov %s1850_s16 }
0x15b7   : > { %p11_p6 = scmp.ge.s32.totalorder %s14_s17, 4   ;;  %s2175_s16 = smov %s2177_s18 }
0x15b9   :  { %13 = sbr.rel (!%p11_p6) target bundleno = 2 (0x2), region = 95 }

// kernel: bilstm_twoff_forward.4
= control target key start
LH: loop header
LB: loop body
LE: loop exit
PB: predicated region body
PF: predicated region fallthrough
CT: control target
= control target key end

     0   :  { %s2095_s15 = smov 0   ;;  %s2097_s16 = smov 0   ;;  %s2419_s0 = inlined_call_operand.vmem [shape: f32[2,64,32], index: 0, kind: input, shape index: {}]   ;;  %s2420_s1 = inlined_call_operand.vmem [shape: f32[2,2,32,128], index: 1, kind: input, shape index: {}]   ;;  %s2421_s2 = inlined_call_operand.vmem [shape: f32[2,1,128], index: 2, kind: input, shape index: {}]   ;;  %s2422_s3 = inlined_call_operand.vmem [shape: f32[2,32,128], index: 3, kind: input, shape index: {}]   ;;  %s2423_s4 = inlined_call_operand.vmem [shape: f32[2,64,32], index: 4, kind: output, shape index: {}]  }
   0x1   :  { %s2099_s17 = smov 0  }
   0x2 LB: > { %s26_s18 = sadd.s32 1, %s2059_s16  ;;  %p1691_p0 = scmp.ge.s32.totalorder %s2063_s17, 1  ;;  %s2063_s17 = sphi %s2099_s17, %s14_s17   ;;  %s2059_s16 = sphi %s2097_s16, %s2425_s16   ;;  %s2055_s15 = sphi %s2095_s15, %s2424_s15  }
   0x3   : > { %p28_p1 = scmp.ge.s32.totalorder %s26_s18, 2  ;;  %p235_p2 = scmp.lt.s32.totalorder %s2063_s17, 3 }
   0x5   : > { %s2427_s18 = smov (%p28_p1, %s26_s18), 0  ;;  %p236_p3 = pnand %p1691_p0, %p235_p2 }
   0x6   : > { %p304_p4 = scmp.lt.s32.totalorder (!%p236_p3), %s2055_s15, 1  ;;  %p657_p5 = scmp.eq.s32.totalorder (!%p236_p3), %s2055_s15, 0 }
   0x7   : > { %239 = sbr.rel (%p236_p3) target bundleno = 5565 (0x15bd), region = 36  ;;  %s2067_s26 = smov (!%p236_p3), 32  }
   0xc   : > { %v1698_v0 = vld [vmem:[%s2419_s0 + $0x40] sm:$0xff]  ;;  %vm363_vm0 = vcmask 261120   ;;  %v2065_v2 = vmov 0.0   ;;  %s2129_s23 = scalar_select %p304_p4, %s2055_s15, 1  ;;  %v1699_v11 = vld [vmem:[%s2419_s0 + $0x48] sm:$0xff]  ;;  %v1700_v13 = vld [vmem:[%s2419_s0 + $0x50] sm:$0xff] }
   0xd   : > { %v337_v1 = vld [vmem:[%s2419_s0] sm:$0xff]  ;;  %1828 = vmatprep.mubr.msk.f32.mxu0 %vm363_vm0, %v1698_v0  ;;  %653 = vst.msk [vmem:[#allocation3] sm:$0xff] %vm363_vm0, %v2065_v2  ;;  %654 = vst.msk [vmem:[#allocation4] sm:$0xff] %vm363_vm0, %v2065_v2  ;;  %v338_v12 = vld [vmem:[%s2419_s0 + $0x8] sm:$0xff]  ;;  %vm2066_vm1 = vmmov 0   ;;  %s2069_s15 = smov 96  }
   0xe   : > { %1848 = vmatprep.mubr.msk.f32.mxu1 %vm363_vm0, %v337_v1  ;;  %s1753_s24 = sshll.u32 %s2129_s23, 6  ;;  %s1754_s28 = sshll.u32 %s2129_s23, 5  ;;  %v339_v14 = vld [vmem:[%s2419_s0 + $0x10] sm:$0xff]  ;;  %v1701_v16 = vld [vmem:[%s2419_s0 + $0x58] sm:$0xff]  ;;  %v1702_v18 = vld [vmem:[%s2419_s0 + $0x60] sm:$0xff] }
   0xf   : > { %s308_s27 = scalar_lea.vmem %s2420_s1, %s1753_s24  ;;  %s2147_s9 = scalar_lea.vmem %s2422_s3, %s1754_s28  ;;  %v340_v17 = vld [vmem:[%s2419_s0 + $0x18] sm:$0xff]  ;;  %v341_v19 = vld [vmem:[%s2419_s0 + $0x20] sm:$0xff]  ;;  %v1703_v21 = vld [vmem:[%s2419_s0 + $0x68] sm:$0xff] }
  0x10   : > { %v1709_v3 = vld [vmem:[%s308_s27 + $0x38] sm:$0xff]  ;;  %v1708_v5 = vld [vmem:[%s308_s27 + $0x30] sm:$0xff]  ;;  %v1707_v7 = vld [vmem:[%s308_s27 + $0x28] sm:$0xff]  ;;  %s311_s20 = scalar_lea.vmem %s2421_s2, %s2129_s23  ;;  %s2266_s30 = scalar_lea.vmem %s2423_s4, %s1753_s24 }
  0x11   : > { %v348_v4 = vld [vmem:[%s308_s27 + $0x18] sm:$0xff]  ;;  %1820 = vmatprep.subr.mxu0 %v1709_v3  ;;  %v347_v6 = vld [vmem:[%s308_s27 + $0x10] sm:$0xff]  ;;  %v346_v8 = vld [vmem:[%s308_s27 + $0x8] sm:$0xff]  ;;  %s2251_s21 = scalar_select %p657_p5, 0, 7 }
  0x12   : > { %1840 = vmatprep.subr.mxu1 %v348_v4  ;;  %1821 = vmatpush3.msra.mxu0 %v1709_v3  ;;  %v1706_v9 = vld [vmem:[%s308_s27 + $0x20] sm:$0xff]  ;;  %v2158_v15 = vld [vmem:[%s2147_s9 + $0x18] sm:$0xff]  ;;  %v2181_v20 = vld [vmem:[%s2147_s9 + $0x10] sm:$0xff]  ;;  %s2285_s23 = scalar_select %p657_p5, 1, 6 }
  0x13   : > { %1841 = vmatpush3.msra.mxu1 %v348_v4  ;;  %1822 = vmatprep.subr.mxu0 %v1708_v5  ;;  %v345_v10 = vld [vmem:[%s308_s27] sm:$0xff]  ;;  %v342_v22 = vld [vmem:[%s2419_s0 + $0x28] sm:$0xff]  ;;  %v1704_v23 = vld [vmem:[%s2419_s0 + $0x70] sm:$0xff]  ;;  %s1727_s22 = sshll.u32 %s2251_s21, 3  ;;  %s2068_s27 = smov 64  }
  0x14   : > { %1842 = vmatprep.subr.mxu1 %v347_v6  ;;  %1823 = vmatpush3.msra.mxu0 %v1708_v5  ;;  %v343_v24 = vld [vmem:[%s2419_s0 + $0x30] sm:$0xff]  ;;  %v2204_v25 = vld [vmem:[%s2147_s9 + $0x8] sm:$0xff]  ;;  %v1705_v26 = vld [vmem:[%s2419_s0 + $0x78] sm:$0xff]  ;;  %s660_s25 = scalar_lea.vmem [#allocation2], %s1727_s22  ;;  %s768_s5 = scalar_lea.vmem %s2266_s30, %s1727_s22 }
  0x15   : > { %1843 = vmatpush3.msra.mxu1 %v347_v6  ;;  %1824 = vmatprep.subr.mxu0 %v1707_v7  ;;  %v344_v27 = vld [vmem:[%s2419_s0 + $0x38] sm:$0xff]  ;;  %v2218_v28 = vld [vmem:[%s2147_s9] sm:$0xff]  ;;  %v656_v5 = vld [vmem:[#allocation4] sm:$0xff]  ;;  %s1730_s24 = sshll.u32 %s2285_s23, 3 }
  0x16   : > { %1844 = vmatprep.subr.mxu1 %v346_v8  ;;  %1825 = vmatpush3.msra.mxu0 %v1707_v7  ;;  %v655_v29 = vld [vmem:[#allocation3] sm:$0xff]  ;;  %s772_s6 = scalar_lea.vmem [#allocation2], %s1730_s24  ;;  %s875_s7 = scalar_lea.vmem %s2266_s30, %s1730_s24 }
  0x17   : > { %1845 = vmatpush3.msra.mxu1 %v346_v8  ;;  %1826 = vmatprep.subr.mxu0 %v1706_v9  ;;  %v1726_v32 = vld [vmem:[%s311_s20] ss:$0 sm:$0xff]  ;;  %s2307_s8 = scalar_select %p657_p5, 2, 5 }
  0x18   : > { %1846 = vmatprep.subr.mxu1 %v345_v10  ;;  %1827 = vmatpush3.msra.mxu0 %v1706_v9  ;;  %s2329_s13 = scalar_select %p657_p5, 3, 4 }
  0x19   : > { %1847 = vmatpush3.msra.mxu1 %v345_v10  ;;  %1829 = vmatmul.mubr.msk.f32.vlgmr.msra.gmra.mxu0 %vm363_vm0, %v1699_v11  ;;  %s1733_s10 = sshll.u32 %s2307_s8, 3 }
  0x1a   : > { %1849 = vmatmul.mubr.msk.f32.vlgmr.msra.gmra.mxu1 %vm363_vm0, %v338_v12  ;;  %1831 = vmatprep.mubr.msk.f32.mxu0 %vm363_vm0, %v1700_v13  ;;  %s879_s11 = scalar_lea.vmem [#allocation2], %s1733_s10  ;;  %s982_s12 = scalar_lea.vmem %s2266_s30, %s1733_s10 }
  0x1b   : > { %1851 = vmatprep.mubr.msk.f32.mxu1 %vm363_vm0, %v339_v14  ;;  %1860 = vmatprep.subr.mxu0 %v2065_v2  ;;  %s1736_s14 = sshll.u32 %s2329_s13, 3 }
  0x1c   : > { %1871 = vmatprep.subr.mxu1 %v2065_v2  ;;  %1861 = vmatpush3.msra.mxu0 %v2158_v15  ;;  %s986_s9 = scalar_lea.vmem [#allocation2], %s1736_s14  ;;  %s1089_s19 = scalar_lea.vmem %s2266_s30, %s1736_s14 }
  0x1d   : > { %1872 = vmatpush3.msra.mxu1 %v2158_v15  ;;  %1832 = vmatmul.mubr.msk.f32.gmra.mxu0 %vm363_vm0, %v1701_v16  ;;  %s2350_s20 = scalar_select %p657_p5, 4, 3 }
  0x1e   : > { %1852 = vmatmul.mubr.msk.f32.gmra.mxu1 %vm363_vm0, %v340_v17  ;;  %1834 = vmatprep.mubr.msk.f32.mxu0 %vm363_vm0, %v1702_v18  ;;  %s2371_s28 = scalar_select %p657_p5, 5, 2 }
  0x1f   : > { %1854 = vmatprep.mubr.msk.f32.mxu1 %vm363_vm0, %v341_v19  ;;  %1862 = vmatprep.subr.mxu0 %v2065_v2  ;;  %s1739_s21 = sshll.u32 %s2350_s20, 3 }
  0x20   : > { %1873 = vmatprep.subr.mxu1 %v2065_v2  ;;  %1863 = vmatpush3.msra.mxu0 %v2181_v20  ;;  %s1093_s22 = scalar_lea.vmem [#allocation2], %s1739_s21  ;;  %s1742_s29 = sshll.u32 %s2371_s28, 3 }
  0x21   : > { %1874 = vmatpush3.msra.mxu1 %v2181_v20  ;;  %1835 = vmatmul.mubr.msk.f32.gmra.mxu0 %vm363_vm0, %v1703_v21  ;;  %s1303_s23 = scalar_lea.vmem %s2266_s30, %s1742_s29 }
  0x22   : > { %1855 = vmatmul.mubr.msk.f32.gmra.mxu1 %vm363_vm0, %v342_v22  ;;  %1837 = vmatprep.mubr.msk.f32.mxu0 %vm363_vm0, %v1704_v23  ;;  %s2383_s24 = scalar_select %p657_p5, 6, 1 }
  0x23   : > { %1857 = vmatprep.mubr.msk.f32.mxu1 %vm363_vm0, %v343_v24  ;;  %1864 = vmatprep.subr.mxu0 %v2065_v2  ;;  %s2395_s10 = scalar_select %p657_p5, 7, 0 }
  0x24   : > { %1875 = vmatprep.subr.mxu1 %v2065_v2  ;;  %1865 = vmatpush3.msra.mxu0 %v2204_v25 }
  0x25   : > { %1876 = vmatpush3.msra.mxu1 %v2204_v25  ;;  %1838 = vmatmul.mubr.msk.f32.gmra.mxu0 %vm363_vm0, %v1705_v26 }
  0x26   : > { %1858 = vmatmul.mubr.msk.f32.gmra.mxu1 %vm363_vm0, %v344_v27  ;;  %1866 = vmatprep.subr.mxu0 %v2065_v2 }
  0x27   : > { %1868 = vmatprep.mubr.msk.f32.mxu0 %vm2066_vm1, %v2065_v2  ;;  %1867 = vmatpush3.msra.mxu0 %v2218_v28 }
  0x28   : > { %1877 = vmatprep.subr.mxu1 %v2065_v2  ;;  %1879 = vmatprep.mubr.msk.f32.mxu1 %vm2066_vm1, %v2065_v2 }
  0x29   : > { %1878 = vmatpush3.msra.mxu1 %v2218_v28  ;;  %1869 = vmatmul.mubr.msk.f32.vlgmr.msra.gmra.mxu0 %vm363_vm0, %v655_v29 }
  0x2a   : > { %1882 = vmatprep.subr.mxu0 %v2065_v2  ;;  %1890 = vmatprep.mubr.msk.f32.mxu0 %vm2066_vm1, %v2065_v2 }
  0x2b   : > { %1883 = vmatpush3.msra.mxu0 %v2158_v15  ;;  %1893 = vmatprep.subr.mxu1 %v2065_v2 }
  0x2c   : > { %1884 = vmatprep.subr.mxu0 %v2065_v2 }
  0x2d   : > { %1885 = vmatpush3.msra.mxu0 %v2181_v20 }
  0x2e   : > { %1886 = vmatprep.subr.mxu0 %v2065_v2 }
  0x2f   : > { %1887 = vmatpush3.msra.mxu0 %v2204_v25 }
  0x30   : > { %1888 = vmatprep.subr.mxu0 %v2065_v2 }
  0x31   : > { %1889 = vmatpush3.msra.mxu0 %v2218_v28 }
  0x32   : > { %1904 = vmatprep.subr.mxu0 %v2065_v2 }
  0xd9   : > { %v1830_v30 = vpop.f32.mrf.mxu0 }
  0xda   : > { %v1850_v31 = vpop.f32.mrf.mxu1 }
  0xdb   : > { %v589_v33 = vadd.f32 %v1850_v31, %v1830_v30  ;;  %v454_v34 = vpop.f32.mrf.mxu0 }
  0xdc   : > { %v583_v35 = vpop.f32.mrf.mxu1 }
  0xdd   : > { %v630_v36 = vadd.f32 %v1726_v32, %v589_v33  ;;  %v584_v37 = vadd.f32 %v583_v35, %v454_v34  ;;  %v1833_v38 = vpop.f32.mrf.mxu0 }
  0xde   : > { %v1853_v39 = vpop.f32.mrf.mxu1 }
  0xdf   : > { %638 = vst [vmem:[#allocation2 + $0x8] sm:$0xff] %v630_v36  ;;  %v629_v40 = vadd.f32 %v1726_v32, %v584_v37  ;;  %v599_v41 = vadd.f32 %v1853_v39, %v1833_v38  ;;  %v464_v42 = vpop.f32.mrf.mxu0 }
  0xe0   : > { %v593_v43 = vpop.f32.mrf.mxu1 }
  0xe1   : > { %637 = vst [vmem:[#allocation2] sm:$0xff] %v629_v40  ;;  %v632_v44 = vadd.f32 %v1726_v32, %v599_v41  ;;  %v594_v45 = vadd.f32 %v593_v43, %v464_v42  ;;  %v1836_v46 = vpop.f32.mrf.mxu0 }
  0xe2   : > { %v1856_v47 = vpop.f32.mrf.mxu1 }
  0xe3   : > { %640 = vst [vmem:[#allocation2 + $0x18] sm:$0xff] %v632_v44  ;;  %v631_v48 = vadd.f32 %v1726_v32, %v594_v45  ;;  %v609_v49 = vadd.f32 %v1856_v47, %v1836_v46  ;;  %v474_v50 = vpop.f32.mrf.mxu0 }
  0xe4   : > { %v603_v51 = vpop.f32.mrf.mxu1 }
  0xe5   : > { %639 = vst [vmem:[#allocation2 + $0x10] sm:$0xff] %v631_v48  ;;  %v634_v52 = vadd.f32 %v1726_v32, %v609_v49  ;;  %v604_v53 = vadd.f32 %v603_v51, %v474_v50  ;;  %v1839_v54 = vpop.f32.mrf.mxu0 }
  0xe6   : > { %v1859_v55 = vpop.f32.mrf.mxu1 }
  0xe7   : > { %642 = vst [vmem:[#allocation2 + $0x28] sm:$0xff] %v634_v52  ;;  %v633_v56 = vadd.f32 %v1726_v32, %v604_v53  ;;  %v619_v57 = vadd.f32 %v1859_v55, %v1839_v54  ;;  %v484_v58 = vpop.f32.mrf.mxu0 }
  0xe8   : > { %v613_v59 = vpop.f32.mrf.mxu1 }
  0xe9   : > { %641 = vst [vmem:[#allocation2 + $0x20] sm:$0xff] %v633_v56  ;;  %v636_v60 = vadd.f32 %v1726_v32, %v619_v57  ;;  %v614_v61 = vadd.f32 %v613_v59, %v484_v58  ;;  %v731_v62 = vpop.f32.mrf.mxu0 }
  0xeb   : > { %644 = vst [vmem:[#allocation2 + $0x38] sm:$0xff] %v636_v60  ;;  %v635_v63 = vadd.f32 %v1726_v32, %v614_v61  ;;  %v1870_v0 = vpop.f32.mrf.mxu0 }
  0xed   : > { %643 = vst [vmem:[#allocation2 + $0x30] sm:$0xff] %v635_v63 }
  0xf4   : > { %v661_v1 = vld [vmem:[%s660_s25] sm:$0xff]  ;;  %s1196_s25 = scalar_lea.vmem %s2266_s30, %s1739_s21 }
  0xf5   : > { %v735_v3 = vadd.f32 %v731_v62, %v661_v1  ;;  %v773_v22 = vld [vmem:[%s772_s6] sm:$0xff]  ;;  %s1745_s6 = sshll.u32 %s2383_s24, 3 }
  0xf6   : > { %v880_v42 = vld [vmem:[%s879_s11] sm:$0xff]  ;;  %s1410_s8 = scalar_lea.vmem %s2266_s30, %s1745_s6  ;;  %s1748_s11 = sshll.u32 %s2395_s10, 3 }
  0xf7   : > { %1977 = vtanh.f32 %v735_v3  ;;  %v1729_v6 = vmul.f32 -1.442695, %v735_v3  ;;  %v987_v60 = vld [vmem:[%s986_s9] sm:$0xff]  ;;  %s1517_s13 = scalar_lea.vmem %s2266_s30, %s1748_s11 }
  0xf9   : > { %1979 = vpow2.f32 %v1729_v6 }
 0x104   : > { %v1978_v4 = vpop.eup %1977 }
 0x105   : > { %749 = vrot.lane.b32.xlu0 %v1978_v4, %s2067_s26 }
 0x106   : > { %v1980_v7 = vpop.eup %1979 }
 0x107   : > { %v739_v8 = vadd.f32 1.0, %v1980_v7 }
 0x109   : > { %744 = vrot.lane.b32.xlu0 %v656_v5, %s2067_s26  ;;  %1981 = vrcp.f32 %v739_v8 }
 0x116   : > { %v1982_v9 = vpop.eup %1981 }
 0x177   : > { %v750_v10 = vpop.permute.xlu0 %749 }
 0x178   : > { %v752_v11 = vmul.f32 %v1982_v9, %v750_v10 }
 0x17a   : > { %754 = vrot.lane.b32.xlu1 %v752_v11, %s2067_s26 }
 0x17b   : > { %v745_v12 = vpop.permute.xlu0 %744 }
 0x17c   : > { %v747_v13 = vmul.f32 %v1982_v9, %v745_v12 }
 0x1ec   : > { %v755_v14 = vpop.permute.xlu1 %754 }
 0x1ed   : > { %v757_v16 = vadd.f32 %v755_v14, %v747_v13 }
 0x1ef   : > { %1983 = vtanh.f32 %v757_v16 }
 0x1fc   : > { %v1984_v17 = vpop.eup %1983 }
 0x1fd   : > { %760 = vrot.lane.b32.xlu1 %v1984_v17, %s2067_s26 }
 0x26f   : > { %v761_v18 = vpop.permute.xlu1 %760 }
 0x270   : > { %v763_v19 = vmul.f32 %v1982_v9, %v761_v18 }
 0x272   : > { %765 = vrot.lane.b32.xlu0 %v763_v19, %s2068_s27 }
 0x2e4   : > { %v766_v21 = vpop.permute.xlu0 %765 }
 0x2e5   : > { %769 = vst.msk [vmem:[%s768_s5] sm:$0xff] %vm363_vm0, %v766_v21  ;;  %1880 = vmatmul.mubr.msk.f32.vlgmr.msra.gmra.mxu1 %vm363_vm0, %v766_v21  ;;  %s1200_s5 = scalar_lea.vmem [#allocation2], %s1742_s29 }
 0x2e6   : > { %1894 = vmatpush3.msra.mxu1 %v2158_v15  ;;  %1901 = vmatprep.mubr.msk.f32.mxu1 %vm2066_vm1, %v2065_v2 }
 0x2e7   : > { %1895 = vmatprep.subr.mxu1 %v2065_v2 }
 0x2e8   : > { %1896 = vmatpush3.msra.mxu1 %v2181_v20 }
 0x2e9   : > { %1897 = vmatprep.subr.mxu1 %v2065_v2 }
 0x2ea   : > { %1898 = vmatpush3.msra.mxu1 %v2204_v25 }
 0x2eb   : > { %1899 = vmatprep.subr.mxu1 %v2065_v2 }
 0x2ec   : > { %1900 = vmatpush3.msra.mxu1 %v2218_v28 }
 0x2ed   : > { %1915 = vmatprep.subr.mxu1 %v2065_v2 }
 0x3a5   : > { %v842_v23 = vpop.f32.mrf.mxu1 }
 0x3a6   : > { %v846_v24 = vadd.f32 %v842_v23, %v773_v22 }
 0x3a7   : > { %v1881_v26 = vpop.f32.mrf.mxu1 }
 0x3a8   : > { %1985 = vtanh.f32 %v846_v24  ;;  %v1732_v29 = vmul.f32 -1.442695, %v846_v24 }
 0x3aa   : > { %1987 = vpow2.f32 %v1732_v29 }
 0x3b5   : > { %v1986_v27 = vpop.eup %1985 }
 0x3b6   : > { %856 = vrot.lane.b32.xlu1 %v1986_v27, %s2067_s26 }
 0x3b7   : > { %v1988_v30 = vpop.eup %1987 }
 0x3b8   : > { %v850_v31 = vadd.f32 1.0, %v1988_v30 }
 0x3ba   : > { %1989 = vrcp.f32 %v850_v31 }
 0x3c7   : > { %v1990_v32 = vpop.eup %1989 }
 0x3c8   : > { %v854_v35 = vmul.f32 %v1990_v32, %v757_v16  ;;  %v1094_v16 = vld [vmem:[%s1093_s22] sm:$0xff] }
 0x428   : > { %v857_v33 = vpop.permute.xlu1 %856 }
 0x429   : > { %v859_v34 = vmul.f32 %v1990_v32, %v857_v33 }
 0x42b   : > { %861 = vrot.lane.b32.xlu0 %v859_v34, %s2067_s26 }
 0x49d   : > { %v862_v36 = vpop.permute.xlu0 %861 }
 0x49e   : > { %v864_v37 = vadd.f32 %v862_v36, %v854_v35 }
 0x4a0   : > { %1991 = vtanh.f32 %v864_v37 }
 0x4ad   : > { %v1992_v38 = vpop.eup %1991 }
 0x4ae   : > { %867 = vrot.lane.b32.xlu1 %v1992_v38, %s2067_s26 }
 0x520   : > { %v868_v39 = vpop.permute.xlu1 %867 }
 0x521   : > { %v870_v40 = vmul.f32 %v1990_v32, %v868_v39 }
 0x523   : > { %872 = vrot.lane.b32.xlu0 %v870_v40, %s2068_s27 }
 0x595   : > { %v873_v41 = vpop.permute.xlu0 %872 }
 0x596   : > { %876 = vst.msk [vmem:[%s875_s7] sm:$0xff] %vm363_vm0, %v873_v41  ;;  %1891 = vmatmul.mubr.msk.f32.vlgmr.msra.gmra.mxu0 %vm363_vm0, %v873_v41  ;;  %s1307_s7 = scalar_lea.vmem [#allocation2], %s1745_s6 }
 0x597   : > { %1905 = vmatpush3.msra.mxu0 %v2158_v15  ;;  %1912 = vmatprep.mubr.msk.f32.mxu0 %vm2066_vm1, %v2065_v2 }
 0x598   : > { %1906 = vmatprep.subr.mxu0 %v2065_v2 }
 0x599   : > { %1907 = vmatpush3.msra.mxu0 %v2181_v20 }
 0x59a   : > { %1908 = vmatprep.subr.mxu0 %v2065_v2 }
 0x59b   : > { %1909 = vmatpush3.msra.mxu0 %v2204_v25 }
 0x59c   : > { %1910 = vmatprep.subr.mxu0 %v2065_v2 }
 0x59d   : > { %1911 = vmatpush3.msra.mxu0 %v2218_v28 }
 0x59e   : > { %1926 = vmatprep.subr.mxu0 %v2065_v2 }
 0x656   : > { %v949_v43 = vpop.f32.mrf.mxu0 }
 0x657   : > { %v953_v44 = vadd.f32 %v949_v43, %v880_v42 }
 0x658   : > { %v1892_v45 = vpop.f32.mrf.mxu0 }
 0x659   : > { %1993 = vtanh.f32 %v953_v44  ;;  %v1735_v47 = vmul.f32 -1.442695, %v953_v44 }
 0x65b   : > { %1995 = vpow2.f32 %v1735_v47 }
 0x666   : > { %v1994_v46 = vpop.eup %1993 }
 0x667   : > { %963 = vrot.lane.b32.xlu1 %v1994_v46, %s2067_s26 }
 0x668   : > { %v1996_v48 = vpop.eup %1995 }
 0x669   : > { %v957_v49 = vadd.f32 1.0, %v1996_v48 }
 0x66b   : > { %1997 = vrcp.f32 %v957_v49 }
 0x678   : > { %v1998_v50 = vpop.eup %1997 }
 0x679   : > { %v961_v53 = vmul.f32 %v1998_v50, %v864_v37 }
 0x6d9   : > { %v964_v51 = vpop.permute.xlu1 %963 }
 0x6da   : > { %v966_v52 = vmul.f32 %v1998_v50, %v964_v51 }
 0x6dc   : > { %968 = vrot.lane.b32.xlu0 %v966_v52, %s2067_s26 }
 0x74e   : > { %v969_v54 = vpop.permute.xlu0 %968 }
 0x74f   : > { %v971_v55 = vadd.f32 %v969_v54, %v961_v53 }
 0x751   : > { %1999 = vtanh.f32 %v971_v55 }
 0x75e   : > { %v2000_v56 = vpop.eup %1999 }
 0x75f   : > { %974 = vrot.lane.b32.xlu1 %v2000_v56, %s2067_s26 }
 0x7d1   : > { %v975_v57 = vpop.permute.xlu1 %974 }
 0x7d2   : > { %v977_v58 = vmul.f32 %v1998_v50, %v975_v57  ;;  %v1308_v50 = vld [vmem:[%s1307_s7] sm:$0xff] }
 0x7d4   : > { %979 = vrot.lane.b32.xlu0 %v977_v58, %s2068_s27 }
 0x846   : > { %v980_v59 = vpop.permute.xlu0 %979 }
 0x847   : > { %983 = vst.msk [vmem:[%s982_s12] sm:$0xff] %vm363_vm0, %v980_v59  ;;  %1902 = vmatmul.mubr.msk.f32.vlgmr.msra.gmra.mxu1 %vm363_vm0, %v980_v59  ;;  %s1414_s12 = scalar_lea.vmem [#allocation2], %s1748_s11 }
 0x848   : > { %1916 = vmatpush3.msra.mxu1 %v2158_v15  ;;  %1923 = vmatprep.mubr.msk.f32.mxu1 %vm2066_vm1, %v2065_v2 }
 0x849   : > { %1917 = vmatprep.subr.mxu1 %v2065_v2 }
 0x84a   : > { %1918 = vmatpush3.msra.mxu1 %v2181_v20 }
 0x84b   : > { %1919 = vmatprep.subr.mxu1 %v2065_v2 }
 0x84c   : > { %1920 = vmatpush3.msra.mxu1 %v2204_v25 }
 0x84d   : > { %1921 = vmatprep.subr.mxu1 %v2065_v2 }
 0x84e   : > { %1922 = vmatpush3.msra.mxu1 %v2218_v28 }
 0x84f   : > { %1937 = vmatprep.subr.mxu1 %v2065_v2 }
 0x907   : > { %v1056_v61 = vpop.f32.mrf.mxu1 }
 0x908   : > { %v1060_v62 = vadd.f32 %v1056_v61, %v987_v60 }
 0x909   : > { %v1903_v63 = vpop.f32.mrf.mxu1 }
 0x90a   : > { %2001 = vtanh.f32 %v1060_v62  ;;  %v1738_v1 = vmul.f32 -1.442695, %v1060_v62 }
 0x90c   : > { %2003 = vpow2.f32 %v1738_v1 }
 0x917   : > { %v2002_v0 = vpop.eup %2001 }
 0x918   : > { %1070 = vrot.lane.b32.xlu1 %v2002_v0, %s2067_s26 }
 0x919   : > { %v2004_v3 = vpop.eup %2003 }
 0x91a   : > { %v1064_v4 = vadd.f32 1.0, %v2004_v3 }
 0x91c   : > { %2005 = vrcp.f32 %v1064_v4 }
 0x929   : > { %v2006_v5 = vpop.eup %2005 }
 0x92a   : > { %v1068_v8 = vmul.f32 %v2006_v5, %v971_v55 }
 0x98a   : > { %v1071_v6 = vpop.permute.xlu1 %1070 }
 0x98b   : > { %v1073_v7 = vmul.f32 %v2006_v5, %v1071_v6 }
 0x98d   : > { %1075 = vrot.lane.b32.xlu0 %v1073_v7, %s2067_s26 }
 0x9ff   : > { %v1076_v9 = vpop.permute.xlu0 %1075 }
 0xa00   : > { %v1078_v10 = vadd.f32 %v1076_v9, %v1068_v8 }
 0xa02   : > { %2007 = vtanh.f32 %v1078_v10 }
 0xa0f   : > { %v2008_v11 = vpop.eup %2007 }
 0xa10   : > { %1081 = vrot.lane.b32.xlu1 %v2008_v11, %s2067_s26 }
 0xa82   : > { %v1082_v12 = vpop.permute.xlu1 %1081 }
 0xa83   : > { %v1084_v13 = vmul.f32 %v2006_v5, %v1082_v12  ;;  %v1415_v5 = vld [vmem:[%s1414_s12] sm:$0xff] }
 0xa85   : > { %1086 = vrot.lane.b32.xlu0 %v1084_v13, %s2068_s27 }
 0xaf7   : > { %v1087_v14 = vpop.permute.xlu0 %1086 }
 0xaf8   : > { %1090 = vst.msk [vmem:[%s1089_s19] sm:$0xff] %vm363_vm0, %v1087_v14  ;;  %1913 = vmatmul.mubr.msk.f32.vlgmr.msra.gmra.mxu0 %vm363_vm0, %v1087_v14 }
 0xaf9   : > { %1927 = vmatpush3.msra.mxu0 %v2158_v15  ;;  %1934 = vmatprep.mubr.msk.f32.mxu0 %vm2066_vm1, %v2065_v2 }
 0xafa   : > { %1928 = vmatprep.subr.mxu0 %v2065_v2 }
 0xafb   : > { %1929 = vmatpush3.msra.mxu0 %v2181_v20 }
 0xafc   : > { %1930 = vmatprep.subr.mxu0 %v2065_v2 }
 0xafd   : > { %1931 = vmatpush3.msra.mxu0 %v2204_v25 }
 0xafe   : > { %1932 = vmatprep.subr.mxu0 %v2065_v2 }
 0xaff   : > { %1933 = vmatpush3.msra.mxu0 %v2218_v28 }
 0xbb8   : > { %v1163_v17 = vpop.f32.mrf.mxu0 }
 0xbb9   : > { %v1167_v18 = vadd.f32 %v1163_v17, %v1094_v16 }
 0xbba   : > { %v1914_v19 = vpop.f32.mrf.mxu0 }
 0xbbb   : > { %2009 = vtanh.f32 %v1167_v18  ;;  %v1741_v22 = vmul.f32 -1.442695, %v1167_v18 }
 0xbbd   : > { %2011 = vpow2.f32 %v1741_v22 }
 0xbc8   : > { %v2010_v21 = vpop.eup %2009 }
 0xbc9   : > { %1177 = vrot.lane.b32.xlu1 %v2010_v21, %s2067_s26 }
 0xbca   : > { %v2012_v23 = vpop.eup %2011 }
 0xbcb   : > { %v1171_v24 = vadd.f32 1.0, %v2012_v23 }
 0xbcd   : > { %2013 = vrcp.f32 %v1171_v24 }
 0xbda   : > { %v2014_v26 = vpop.eup %2013 }
 0xbdb   : > { %v1175_v30 = vmul.f32 %v2014_v26, %v1078_v10 }
 0xc3b   : > { %v1178_v27 = vpop.permute.xlu1 %1177 }
 0xc3c   : > { %v1180_v29 = vmul.f32 %v2014_v26, %v1178_v27 }
 0xc3e   : > { %1182 = vrot.lane.b32.xlu0 %v1180_v29, %s2067_s26 }
 0xcb0   : > { %v1183_v31 = vpop.permute.xlu0 %1182 }
 0xcb1   : > { %v1185_v32 = vadd.f32 %v1183_v31, %v1175_v30 }
 0xcb3   : > { %2015 = vtanh.f32 %v1185_v32 }
 0xcc0   : > { %v2016_v33 = vpop.eup %2015 }
 0xcc1   : > { %1188 = vrot.lane.b32.xlu1 %v2016_v33, %s2067_s26 }
 0xd33   : > { %v1189_v34 = vpop.permute.xlu1 %1188 }
 0xd34   : > { %v1191_v35 = vmul.f32 %v2014_v26, %v1189_v34 }
 0xd36   : > { %1193 = vrot.lane.b32.xlu0 %v1191_v35, %s2068_s27 }
 0xda8   : > { %v1194_v36 = vpop.permute.xlu0 %1193 }
 0xda9   : > { %1197 = vst.msk [vmem:[%s1196_s25] sm:$0xff] %vm363_vm0, %v1194_v36  ;;  %1924 = vmatmul.mubr.msk.f32.vlgmr.msra.gmra.mxu1 %vm363_vm0, %v1194_v36 }
 0xdaa   : > { %1938 = vmatpush3.msra.mxu1 %v2158_v15  ;;  %1945 = vmatprep.mubr.msk.f32.mxu1 %vm2066_vm1, %v2065_v2  ;;  %v1201_v15 = vld [vmem:[%s1200_s5] sm:$0xff] }
 0xdab   : > { %1939 = vmatprep.subr.mxu1 %v2065_v2 }
 0xdac   : > { %1940 = vmatpush3.msra.mxu1 %v2181_v20 }
 0xdad   : > { %1941 = vmatprep.subr.mxu1 %v2065_v2 }
 0xdae   : > { %1942 = vmatpush3.msra.mxu1 %v2204_v25 }
 0xdaf   : > { %1943 = vmatprep.subr.mxu1 %v2065_v2 }
 0xdb0   : > { %1944 = vmatpush3.msra.mxu1 %v2218_v28 }
 0xe69   : > { %v1270_v37 = vpop.f32.mrf.mxu1 }
 0xe6a   : > { %v1274_v38 = vadd.f32 %v1270_v37, %v1201_v15 }
 0xe6b   : > { %v1925_v39 = vpop.f32.mrf.mxu1 }
 0xe6c   : > { %2017 = vtanh.f32 %v1274_v38  ;;  %v1744_v40 = vmul.f32 -1.442695, %v1274_v38 }
 0xe6e   : > { %2019 = vpow2.f32 %v1744_v40 }
 0xe79   : > { %v2018_v20 = vpop.eup %2017 }
 0xe7a   : > { %1284 = vrot.lane.b32.xlu1 %v2018_v20, %s2067_s26 }
 0xe7b   : > { %v2020_v25 = vpop.eup %2019 }
 0xe7c   : > { %v1278_v2 = vadd.f32 1.0, %v2020_v25 }
 0xe7e   : > { %2021 = vrcp.f32 %v1278_v2 }
 0xe8b   : > { %v2022_v28 = vpop.eup %2021 }
 0xe8c   : > { %v1282_v43 = vmul.f32 %v2022_v28, %v1185_v32 }
 0xeec   : > { %v1285_v41 = vpop.permute.xlu1 %1284 }
 0xeed   : > { %v1287_v42 = vmul.f32 %v2022_v28, %v1285_v41 }
 0xeef   : > { %1289 = vrot.lane.b32.xlu0 %v1287_v42, %s2067_s26 }
 0xf61   : > { %v1290_v44 = vpop.permute.xlu0 %1289 }
 0xf62   : > { %v1292_v45 = vadd.f32 %v1290_v44, %v1282_v43 }
 0xf64   : > { %2023 = vtanh.f32 %v1292_v45 }
 0xf71   : > { %v2024_v46 = vpop.eup %2023 }
 0xf72   : > { %1295 = vrot.lane.b32.xlu1 %v2024_v46, %s2067_s26 }
 0xfe4   : > { %v1296_v47 = vpop.permute.xlu1 %1295 }
 0xfe5   : > { %v1298_v48 = vmul.f32 %v2022_v28, %v1296_v47 }
 0xfe7   : > { %1300 = vrot.lane.b32.xlu0 %v1298_v48, %s2068_s27 }
0x1059   : > { %v1301_v49 = vpop.permute.xlu0 %1300 }
0x105a   : > { %1304 = vst.msk [vmem:[%s1303_s23] sm:$0xff] %vm363_vm0, %v1301_v49  ;;  %1935 = vmatmul.mubr.msk.f32.vlgmr.msra.gmra.mxu0 %vm363_vm0, %v1301_v49 }
0x111a   : > { %v1377_v51 = vpop.f32.mrf.mxu0 }
0x111b   : > { %v1381_v52 = vadd.f32 %v1377_v51, %v1308_v50 }
0x111c   : > { %v1936_v53 = vpop.f32.mrf.mxu0 }
0x111d   : > { %2025 = vtanh.f32 %v1381_v52  ;;  %v1747_v55 = vmul.f32 -1.442695, %v1381_v52 }
0x111f   : > { %2027 = vpow2.f32 %v1747_v55 }
0x112a   : > { %v2026_v54 = vpop.eup %2025 }
0x112b   : > { %1391 = vrot.lane.b32.xlu1 %v2026_v54, %s2067_s26 }
0x112c   : > { %v2028_v56 = vpop.eup %2027 }
0x112d   : > { %v1385_v57 = vadd.f32 1.0, %v2028_v56 }
0x112f   : > { %2029 = vrcp.f32 %v1385_v57 }
0x113c   : > { %v2030_v58 = vpop.eup %2029 }
0x113d   : > { %v1389_v61 = vmul.f32 %v2030_v58, %v1292_v45 }
0x119d   : > { %v1392_v59 = vpop.permute.xlu1 %1391 }
0x119e   : > { %v1394_v60 = vmul.f32 %v2030_v58, %v1392_v59 }
0x11a0   : > { %1396 = vrot.lane.b32.xlu0 %v1394_v60, %s2067_s26 }
0x1212   : > { %v1397_v62 = vpop.permute.xlu0 %1396 }
0x1213   : > { %v1399_v63 = vadd.f32 %v1397_v62, %v1389_v61 }
0x1215   : > { %2031 = vtanh.f32 %v1399_v63 }
0x1222   : > { %v2032_v0 = vpop.eup %2031 }
0x1223   : > { %1402 = vrot.lane.b32.xlu1 %v2032_v0, %s2067_s26 }
0x1295   : > { %v1403_v1 = vpop.permute.xlu1 %1402 }
0x1296   : > { %v1405_v3 = vmul.f32 %v2030_v58, %v1403_v1 }
0x1298   : > { %1407 = vrot.lane.b32.xlu0 %v1405_v3, %s2068_s27 }
0x130a   : > { %v1408_v4 = vpop.permute.xlu0 %1407 }
0x130b   : > { %1411 = vst.msk [vmem:[%s1410_s8] sm:$0xff] %vm363_vm0, %v1408_v4  ;;  %1946 = vmatmul.mubr.msk.f32.vlgmr.msra.gmra.mxu1 %vm363_vm0, %v1408_v4 }
0x13cb   : > { %v1484_v6 = vpop.f32.mrf.mxu1 }
0x13cc   : > { %v1488_v7 = vadd.f32 %v1484_v6, %v1415_v5 }
0x13cd   : > { %v1947_v8 = vpop.f32.mrf.mxu1 }
0x13ce   : > { %2033 = vtanh.f32 %v1488_v7  ;;  %v1750_v10 = vmul.f32 -1.442695, %v1488_v7 }
0x13d0   : > { %2035 = vpow2.f32 %v1750_v10 }
0x13db   : > { %v2034_v9 = vpop.eup %2033 }
0x13dc   : > { %1498 = vrot.lane.b32.xlu1 %v2034_v9, %s2067_s26 }
0x13dd   : > { %v2036_v11 = vpop.eup %2035 }
0x13de   : > { %v1492_v12 = vadd.f32 1.0, %v2036_v11 }
0x13e0   : > { %2037 = vrcp.f32 %v1492_v12 }
0x13ed   : > { %v2038_v13 = vpop.eup %2037 }
0x13ee   : > { %v1496_v17 = vmul.f32 %v2038_v13, %v1399_v63 }
0x144e   : > { %v1499_v14 = vpop.permute.xlu1 %1498 }
0x144f   : > { %v1501_v16 = vmul.f32 %v2038_v13, %v1499_v14 }
0x1451   : > { %1503 = vrot.lane.b32.xlu0 %v1501_v16, %s2067_s26 }
0x14c3   : > { %v1504_v18 = vpop.permute.xlu0 %1503 }
0x14c4   : > { %v1506_v19 = vadd.f32 %v1504_v18, %v1496_v17 }
0x14c6   : > { %2039 = vtanh.f32 %v1506_v19 }
0x14d3   : > { %v2040_v21 = vpop.eup %2039 }
0x14d4   : > { %1509 = vrot.lane.b32.xlu1 %v2040_v21, %s2067_s26 }
0x14d8   : > { %1521 = vrot.lane.b32.xlu1 %v1506_v19, %s2069_s15 }
0x1546   : > { %v1510_v22 = vpop.permute.xlu1 %1509 }
0x1547   : > { %v1512_v23 = vmul.f32 %v2038_v13, %v1510_v22 }
0x1549   : > { %1514 = vrot.lane.b32.xlu0 %v1512_v23, %s2068_s27 }
0x154a   : > { %v1522_v24 = vpop.permute.xlu1 %1521 }
0x154b   : > { %1524 = vst.msk [vmem:[#allocation4] sm:$0xff] %vm363_vm0, %v1522_v24 }
0x15bb   : > { %v1515_v26 = vpop.permute.xlu0 %1514 }
0x15bc   : > { %1518 = vst.msk [vmem:[%s1517_s13] sm:$0xff] %vm363_vm0, %v1515_v26  ;;  %1519 = vst.msk [vmem:[#allocation3] sm:$0xff] %vm363_vm0, %v1515_v26 }
0x15bd PF: > { %s14_s17 = sadd.s32 1, %s2063_s17   ;;  %s2424_s15 = smov %s2059_s16 }
0x15be   : > { %p11_p6 = scmp.ge.s32.totalorder %s14_s17, 4   ;;  %s2425_s16 = smov %s2427_s18 }
0x15c0   :  { %13 = sbr.rel (!%p11_p6) target bundleno = 2 (0x2), region = 97 }

</bundles_post_ra>
